<compile_context>
chip_gen: v5e
topology: v5e:2x2
jax: 0.10.0
libtpu: 0.0.40
codegen_flags: <defaults>
</compile_context>

<pallas_src>
import functools

import jax
import jax.numpy as jnp
import numpy as np
from jax import lax
from jax.experimental import pallas as pl
from jax.experimental.pallas import tpu as pltpu

_BN_EPS = 1e-5


# --------------------------- chip-dependent knobs ---------------------------

def _device_kind():
    try:
        return jax.devices()[0].device_kind.lower()
    except Exception:
        return ""


def _default_elementwise_dtype():
    kind = _device_kind()
    # v6e / v7x VPU+EUP run bf16 natively; v5e (and older) do not, so bf16
    # elementwise there would only add conversion cost -> keep f32.
    if any(tag in kind for tag in ("v6", "v7", "7x")):
        return jnp.bfloat16
    return jnp.float32


def _vmem_cap_bytes():
    kind = _device_kind()
    if "v7" in kind or "7x" in kind:
        return 48 << 20            # v7x: 64 MiB physical VMEM per TC
    return 96 << 20                # v5e / v6e: 128 MiB physical


# ----------------------------- kernel helpers ------------------------------

def _erf(x, approx_recip):
    # Abramowitz & Stegun 7.1.26 polynomial (|err| < 1.5e-7 in f32): only ops
    # that lower cleanly in Mosaic (abs, exp, where, mul/add, recip).
    a1, a2, a3, a4, a5 = (0.254829592, -0.284496736, 1.421413741,
                          -1.453152027, 1.061405429)
    p = 0.3275911
    ax = jnp.abs(x)
    denom = 1.0 + p * ax
    if approx_recip:
        # EUP approximate reciprocal: the divide would otherwise burn VALU
        # cycles in the most VALU-bound phase (GELU runs twice per hidden
        # element); the EUP slot is idle apart from the exp.
        t = pl.reciprocal(denom.astype(jnp.float32), approx=True).astype(x.dtype)
    else:
        t = 1.0 / denom
    poly = ((((a5 * t + a4) * t + a3) * t + a2) * t + a1) * t
    y = 1.0 - poly * jnp.exp(-ax * ax)
    return jnp.where(x >= 0, y, -y)


def _gelu(x, approx_recip):
    # matches PyTorch F.gelu (erf-based, non-approximate)
    return 0.5 * x * (1.0 + _erf(x * 0.7071067811865476, approx_recip))


def _ffn_kernel(x_ref, mask_ref, w_in_ref, b_in_ref, w1_ref, wdw_ref,
                c1_ref, d1_ref, c2_ref, d2_ref, w_out_ref, b_out_ref,
                o_ref, *, img_w, hw, bb, approx_recip):
    # Small constant blocks loaded once per grid step (shared by all bb images).
    masks = mask_ref[...]                # (9, HWp) 0/1 boundary, elementwise dtype
    w1 = w1_ref[...]                     # (Ch, 9)  rep_conv1 * BN1
    wdw = wdw_ref[...]                   # (Ch, 9)  dwconv
    c1, d1 = c1_ref[...], d1_ref[...]    # (Ch, 1)  folded scale/shift
    c2, d2 = c2_ref[...], d2_ref[...]
    w_in, b_in = w_in_ref[...], b_in_ref[...]
    w_out, b_out = w_out_ref[...], b_out_ref[...]
    ew = w1.dtype

    for bi in range(bb):                 # bb whole images per grid step
        x = x_ref[bi]                    # (C, HWp) float32

        # project_in: 1x1 conv == channel matmul on the MXU (weights already in
        # the MXU dtype from the host; f32 accumulation).
        h32 = jnp.dot(w_in, x.astype(w_in.dtype),
                      preferred_element_type=jnp.float32) + b_in
        h = h32.astype(ew)                                   # (Ch, HWp)

        # Both depthwise 3x3 branches share each shifted+masked tap:
        #   x1 = h + rep_conv1(h) + rep_conv2(h)  (BN + center folded into c1/d1)
        #   x2 = dwconv(h) + b_dw                 (center folded into c2/d2)
        acc1 = c1 * h
        acc2 = c2 * h
        for dy in (-1, 0, 1):
            for dx in (-1, 0, 1):
                if dy == 0 and dx == 0:
                    continue             # center taps folded above
                k = (dy + 1) * 3 + (dx + 1)
                d = dy * img_w + dx
                # shifted[i] = h[i + d] with zero pad: XLU lane roll + VPU mask
                sh = pltpu.roll(h, shift=(-d) % hw, axis=1) * masks[k:k + 1, :]
                acc1 = acc1 + sh * w1[:, k:k + 1]
                acc2 = acc2 + sh * wdw[:, k:k + 1]
        x1 = acc1 + d1
        x2 = acc2 + d2

        g = _gelu(x2, approx_recip) * x1 + _gelu(x1, approx_recip) * x2

        # project_out: 1x1 conv == channel matmul (MXU) + bias + residual (f32).
        out = jnp.dot(w_out, g.astype(w_out.dtype),
                      preferred_element_type=jnp.float32)
        o_ref[bi] = out + b_out + x


# ------------------------------ host wrapper -------------------------------

@functools.lru_cache(maxsize=None)
def _tap_masks_np(H, W):
    """(9, HW) 0/1 masks: mask[k, i]==1 iff tap k of a 3x3/pad=1 conv at flat
    position i stays inside the image.  Built once per (H, W)."""
    HW = H * W
    r, c = np.arange(HW) // W, np.arange(HW) % W
    m = np.zeros((9, HW), np.float32)
    for dy in (-1, 0, 1):
        for dx in (-1, 0, 1):
            k = (dy + 1) * 3 + (dx + 1)
            m[k] = ((r + dy >= 0) & (r + dy < H) & (c + dx >= 0) & (c + dx < W))
    return m


def _full_spec(arr):
    nd = arr.ndim
    return pl.BlockSpec(arr.shape, lambda b: (0,) * nd)


def _plan_tiles(B, C, Ch, HWp, ew_bytes):
    """Pick images-per-step (bb) and a scoped-VMEM limit from the working set."""
    slab = Ch * HWp
    # live per-image intermediates (~7 elementwise-dtype slabs: h/acc1/acc2/sh/
    # x1/x2/g) + f32 h32/out + the (9, HWp) masks.
    inner = 7 * slab * ew_bytes + 2 * slab * 4 + 9 * HWp * ew_bytes
    cap = _vmem_cap_bytes()
    budget = int(0.6 * cap)
    bb = 1
    for cand in range(1, min(B, 8) + 1):
        if B % cand:
            continue
        io = 2 * 2 * cand * C * HWp * 4        # double-buffered in + out blocks
        if io + inner + (1 << 20) <= budget:
            bb = cand
    io = 2 * 2 * bb * C * HWp * 4
    est = io + inner + (2 << 20)
    vmem_limit = int(min(cap, max(32 << 20, int(est * 1.5))))
    return bb, vmem_limit


def feedforward_pallas(x_nchw, fp, *, matmul_dtype=jnp.bfloat16,
                       elementwise_dtype=None, approx_recip=True,
                       images_per_step=None):
    """fp: folded params from fold_params().

    Production defaults: bf16 MXU operands (f32 accumulation) and bf16
    elementwise on v6e/v7x (f32 on v5e), erf divide on the EUP via approx
    reciprocal.  Pass matmul_dtype=elementwise_dtype=jnp.float32 and
    approx_recip=False for a bit-tight numerics path (used by the self-check).
    """
    B, C, H, W = x_nchw.shape
    HW = H * W
    HWp = -(-HW // 128) * 128        # lane-dense (multiple of 128) -> unmasked vst
    Ch = fp["w_in"].shape[0]
    ew = _default_elementwise_dtype() if elementwise_dtype is None else elementwise_dtype
    mm = matmul_dtype
    ew_bytes = jnp.dtype(ew).itemsize

    bb, vmem_limit = _plan_tiles(B, C, Ch, HWp, ew_bytes)
    if images_per_step is not None:
        assert B % images_per_step == 0
        bb = images_per_step

    x = x_nchw.reshape(B, C, HW).astype(jnp.float32)        # NCHW -> (B, C, HW)
    masks = _tap_masks_np(H, W)
    if HWp != HW:
        # Padding columns are always masked off / sliced away: real positions
        # never read pad taps because edge taps are already mask==0.
        x = jnp.pad(x, ((0, 0), (0, 0), (0, HWp - HW)))
        masks = np.pad(masks, ((0, 0), (0, HWp - HW)))
    masks = jnp.asarray(masks, dtype=ew)

    # Weights cast once host-side (never per grid step inside the kernel).
    args = (x, masks,
            fp["w_in"].astype(mm), fp["b_in"],
            fp["w1"].astype(ew), fp["wdw"].astype(ew),
            fp["c1"].astype(ew), fp["d1"].astype(ew),
            fp["c2"].astype(ew), fp["d2"].astype(ew),
            fp["w_out"].astype(mm), fp["b_out"])
    in_specs = [pl.BlockSpec((bb, C, HWp), lambda b: (b, 0, 0))]
    in_specs += [_full_spec(a) for a in args[1:]]

    kernel = functools.partial(_ffn_kernel, img_w=W, hw=HWp, bb=bb,
                               approx_recip=approx_recip)

    mm_bytes = jnp.dtype(mm).itemsize
    const_bytes = (2 * C * Ch * mm_bytes + 22 * Ch * ew_bytes
                   + (Ch + C) * 4 + 9 * HWp * ew_bytes)
    n_steps = B // bb
    cost = pl.CostEstimate(
        flops=int(B * HWp * Ch * (4 * C + 90) + 2 * B * HWp * C),
        transcendentals=int((4 if approx_recip else 2) * B * HWp * Ch),
        bytes_accessed=int(2 * B * C * HWp * 4 + n_steps * const_bytes))

    # TODO(synk): for single images whose (Ch, HW) slabs approach VMEM, add a
    # second grid axis over row bands with a 1-row halo (recompute project_in
    # for the halo rows); whole images are currently the tiling granule.
    # TODO(synk): optional fp8 w_in/w_out (scales folded into biases) on v7x if
    # the 1x1 convs become the binder at large Ch.
    # TODO(synk): VPU broadcast-multiply-add fallback for project_in/out when
    # C/Ch are tiny (<~8); the MXU is <2% utilized at such widths.
    out = pl.pallas_call(
        kernel,
        out_shape=jax.ShapeDtypeStruct((B, C, HWp), jnp.float32),
        grid_spec=pltpu.PrefetchScalarGridSpec(
            num_scalar_prefetch=0,
            grid=(n_steps,),
            in_specs=in_specs,
            out_specs=pl.BlockSpec((bb, C, HWp), lambda b: (b, 0, 0)),
        ),
        compiler_params=pltpu.CompilerParams(
            dimension_semantics=("parallel",),
            vmem_limit_bytes=vmem_limit),
        cost_estimate=cost,
    )(*args)
    return out[:, :, :HW].reshape(B, C, H, W)


# ---------------------- parameters (deterministic init) --------------------

def init_params(key, dim, hidden):
    ks = jax.random.split(key, 16)
    n = lambda k, shape, s: s * jax.random.normal(k, shape, jnp.float32)
    return dict(
        W_in=n(ks[0], (hidden, dim), 0.30), b_in=n(ks[1], (hidden,), 0.10),
        w_rep1=n(ks[2], (hidden, 3, 3), 0.20), w_rep2=n(ks[3], (hidden,), 0.50),
        w_dw=n(ks[4], (hidden, 3, 3), 0.20), b_dw=n(ks[5], (hidden,), 0.10),
        W_out=n(ks[6], (dim, hidden), 0.30), b_out=n(ks[7], (dim,), 0.10),
        gamma1=1.0 + n(ks[8], (hidden,), 0.10), beta1=n(ks[9], (hidden,), 0.10),
        mean1=n(ks[10], (hidden,), 0.10),
        var1=1.0 + jnp.abs(n(ks[11], (hidden,), 0.10)),
        gamma2=1.0 + n(ks[12], (hidden,), 0.10), beta2=n(ks[13], (hidden,), 0.10),
        mean2=n(ks[14], (hidden,), 0.10),
        var2=1.0 + jnp.abs(n(ks[15], (hidden,), 0.10)),
    )


def fold_params(p):
    """Fold eval-mode BatchNorm, the identity branch, rep_conv2 (1x1 dw) and
    both 3x3 center taps into per-channel scale/shift; lay weights out for the
    lane-dense (Ch, HW) kernel (tap order k = (dy+1)*3 + (dx+1)). All f32;
    dtype casts for the MXU / elementwise phases happen in feedforward_pallas."""
    inv1 = p["gamma1"] / jnp.sqrt(p["var1"] + _BN_EPS)
    inv2 = p["gamma2"] / jnp.sqrt(p["var2"] + _BN_EPS)
    w1 = p["w_rep1"] * inv1[:, None, None]            # (Ch, 3, 3) BN-scaled
    t1 = p["beta1"] - p["mean1"] * inv1
    s2 = p["w_rep2"] * inv2
    t2 = p["beta2"] - p["mean2"] * inv2
    Ch = w1.shape[0]
    col = lambda v: v.reshape(-1, 1)
    return dict(
        w_in=p["W_in"], b_in=col(p["b_in"]),
        w1=w1.reshape(Ch, 9), wdw=p["w_dw"].reshape(Ch, 9),
        c1=col(1.0 + s2 + w1[:, 1, 1]),               # identity + rep2 + center
        d1=col(t1 + t2),
        c2=col(p["w_dw"][:, 1, 1]), d2=col(p["b_dw"]),
        w_out=p["W_out"], b_out=col(p["b_out"]),
    )


# ------------------------- pure-JAX reference (NCHW) ------------------------

def reference_forward(x, p):
    dn = ("NCHW", "OIHW", "NCHW")
    conv = functools.partial(lax.conv_general_dilated, dimension_numbers=dn)

    def conv1x1(v, w_oi, b):
        return conv(v, w_oi[:, :, None, None], (1, 1), "VALID") + b[None, :, None, None]

    def dw3x3(v, w):
        return conv(v, w[:, None, :, :], (1, 1), ((1, 1), (1, 1)),
                    feature_group_count=w.shape[0])

    def bn(v, g, b, m, var):
        s = g / jnp.sqrt(var + _BN_EPS)
        return (v - m[None, :, None, None]) * s[None, :, None, None] + b[None, :, None, None]

    gelu = lambda v: jax.nn.gelu(v, approximate=False)
    h = conv1x1(x, p["W_in"], p["b_in"])
    rep1 = bn(dw3x3(h, p["w_rep1"]), p["gamma1"], p["beta1"], p["mean1"], p["var1"])
    rep2 = bn(h * p["w_rep2"][None, :, None, None],
              p["gamma2"], p["beta2"], p["mean2"], p["var2"])
    x1 = h + rep1 + rep2
    x2 = dw3x3(h, p["w_dw"]) + p["b_dw"][None, :, None, None]
    g = gelu(x2) * x1 + gelu(x1) * x2
    return conv1x1(g, p["W_out"], p["b_out"]) + x


# ----------------------------------- main -----------------------------------

if __name__ == "__main__":
    dim, ffn_expansion_factor = 4, 2.0
    hidden = int(dim * ffn_expansion_factor)   # 8
    B, H, W = 2, 16, 16

    key = jax.random.PRNGKey(0)
    kx, kp = jax.random.split(key)
    x = jax.random.normal(kx, (B, dim, H, W), jnp.float32)   # NCHW like PyTorch

    raw = init_params(kp, dim, hidden)
    folded = fold_params(raw)
    ref = reference_forward(x, raw)

    # 1) strict numerics check: f32 everywhere, exact divide in erf.
    out_f32 = feedforward_pallas(x, folded, matmul_dtype=jnp.float32,
                                 elementwise_dtype=jnp.float32,
                                 approx_recip=False)
    out_f32 = jax.block_until_ready(out_f32)
    np.testing.assert_allclose(np.asarray(out_f32), np.asarray(ref),
                               rtol=1e-3, atol=1e-3)

    # 2) production path: bf16 MXU operands (+ bf16 elementwise on v6e/v7x) and
    #    EUP approx reciprocal.  Loose tolerance: bf16 rounding of the hidden
    #    slabs; semantics are verified by the f32 check above.
    out_prod = feedforward_pallas(x, folded)
    out_prod = jax.block_until_ready(out_prod)
    assert out_prod.shape == x.shape and out_prod.dtype == x.dtype
    np.testing.assert_allclose(np.asarray(out_prod), np.asarray(ref),
                               rtol=1e-1, atol=1e-1)
    print("KERNEL_OK")
</pallas_src>

<mosaic_0001>
module attributes {stable_mosaic.version = 11 : i64} {
  func.func @_ffn_kernel(%arg0: i32, %arg1: memref<2x4x256xf32, #tpu.memory_space<vmem>>, %arg2: memref<9x256xf32, #tpu.memory_space<vmem>>, %arg3: memref<8x4xf32, #tpu.memory_space<vmem>>, %arg4: memref<8x1xf32, #tpu.memory_space<vmem>>, %arg5: memref<8x9xf32, #tpu.memory_space<vmem>>, %arg6: memref<8x9xf32, #tpu.memory_space<vmem>>, %arg7: memref<8x1xf32, #tpu.memory_space<vmem>>, %arg8: memref<8x1xf32, #tpu.memory_space<vmem>>, %arg9: memref<8x1xf32, #tpu.memory_space<vmem>>, %arg10: memref<8x1xf32, #tpu.memory_space<vmem>>, %arg11: memref<4x8xf32, #tpu.memory_space<vmem>>, %arg12: memref<4x1xf32, #tpu.memory_space<vmem>>, %arg13: memref<2x4x256xf32, #tpu.memory_space<vmem>>) attributes {dimension_semantics = [#tpu.dimension_semantics<parallel>], iteration_bounds = array<i64: 1>, scalar_prefetch = 0 : i64, scratch_operands = 0 : i64, tpu.core_type = #tpu.core_type<tc>, window_params = [{transform_indices = @transform_0, window_bounds = array<i64: 2, 4, 256>}, {pipeline_mode = #tpu.pipeline_mode<synchronous>, transform_indices = @transform_1, window_bounds = array<i64: 9, 256>}, {pipeline_mode = #tpu.pipeline_mode<synchronous>, transform_indices = @transform_2, window_bounds = array<i64: 8, 4>}, {pipeline_mode = #tpu.pipeline_mode<synchronous>, transform_indices = @transform_3, window_bounds = array<i64: 8, 1>}, {pipeline_mode = #tpu.pipeline_mode<synchronous>, transform_indices = @transform_4, window_bounds = array<i64: 8, 9>}, {pipeline_mode = #tpu.pipeline_mode<synchronous>, transform_indices = @transform_5, window_bounds = array<i64: 8, 9>}, {pipeline_mode = #tpu.pipeline_mode<synchronous>, transform_indices = @transform_6, window_bounds = array<i64: 8, 1>}, {pipeline_mode = #tpu.pipeline_mode<synchronous>, transform_indices = @transform_7, window_bounds = array<i64: 8, 1>}, {pipeline_mode = #tpu.pipeline_mode<synchronous>, transform_indices = @transform_8, window_bounds = array<i64: 8, 1>}, {pipeline_mode = #tpu.pipeline_mode<synchronous>, transform_indices = @transform_9, window_bounds = array<i64: 8, 1>}, {pipeline_mode = #tpu.pipeline_mode<synchronous>, transform_indices = @transform_10, window_bounds = array<i64: 4, 8>}, {pipeline_mode = #tpu.pipeline_mode<synchronous>, transform_indices = @transform_11, window_bounds = array<i64: 4, 1>}, {transform_indices = @transform_12, window_bounds = array<i64: 2, 4, 256>}]} {
    %c0 = arith.constant 0 : index
    %c0_0 = arith.constant 0 : index
    %0 = vector.load %arg2[%c0, %c0_0] : memref<9x256xf32, #tpu.memory_space<vmem>>, vector<9x256xf32>
    %c0_1 = arith.constant 0 : index
    %c0_2 = arith.constant 0 : index
    %1 = vector.load %arg5[%c0_1, %c0_2] : memref<8x9xf32, #tpu.memory_space<vmem>>, vector<8x9xf32>
    %c0_3 = arith.constant 0 : index
    %c0_4 = arith.constant 0 : index
    %2 = vector.load %arg6[%c0_3, %c0_4] : memref<8x9xf32, #tpu.memory_space<vmem>>, vector<8x9xf32>
    %c0_5 = arith.constant 0 : index
    %c0_6 = arith.constant 0 : index
    %3 = vector.load %arg7[%c0_5, %c0_6] : memref<8x1xf32, #tpu.memory_space<vmem>>, vector<8x1xf32>
    %c0_7 = arith.constant 0 : index
    %c0_8 = arith.constant 0 : index
    %4 = vector.load %arg8[%c0_7, %c0_8] : memref<8x1xf32, #tpu.memory_space<vmem>>, vector<8x1xf32>
    %c0_9 = arith.constant 0 : index
    %c0_10 = arith.constant 0 : index
    %5 = vector.load %arg9[%c0_9, %c0_10] : memref<8x1xf32, #tpu.memory_space<vmem>>, vector<8x1xf32>
    %c0_11 = arith.constant 0 : index
    %c0_12 = arith.constant 0 : index
    %6 = vector.load %arg10[%c0_11, %c0_12] : memref<8x1xf32, #tpu.memory_space<vmem>>, vector<8x1xf32>
    %c0_13 = arith.constant 0 : index
    %c0_14 = arith.constant 0 : index
    %7 = vector.load %arg3[%c0_13, %c0_14] : memref<8x4xf32, #tpu.memory_space<vmem>>, vector<8x4xf32>
    %c0_15 = arith.constant 0 : index
    %c0_16 = arith.constant 0 : index
    %8 = vector.load %arg4[%c0_15, %c0_16] : memref<8x1xf32, #tpu.memory_space<vmem>>, vector<8x1xf32>
    %c0_17 = arith.constant 0 : index
    %c0_18 = arith.constant 0 : index
    %9 = vector.load %arg11[%c0_17, %c0_18] : memref<4x8xf32, #tpu.memory_space<vmem>>, vector<4x8xf32>
    %c0_19 = arith.constant 0 : index
    %c0_20 = arith.constant 0 : index
    %10 = vector.load %arg12[%c0_19, %c0_20] : memref<4x1xf32, #tpu.memory_space<vmem>>, vector<4x1xf32>
    %c0_21 = arith.constant 0 : index
    %c0_22 = arith.constant 0 : index
    %c0_23 = arith.constant 0 : index
    %11 = vector.load %arg1[%c0_21, %c0_22, %c0_23] : memref<2x4x256xf32, #tpu.memory_space<vmem>>, vector<1x4x256xf32>
    %12 = vector.shape_cast %11 : vector<1x4x256xf32> to vector<4x256xf32>
    %cst = arith.constant dense<0.000000e+00> : vector<8x256xf32>
    %13 = tpu.matmul %7, %12, %cst {dimension_numbers = #tpu.dot_dimension_numbers<[1], [0], [0], [1], [0, 0, 1, 1], [], []>} : vector<8x4xf32>, vector<4x256xf32>, vector<8x256xf32> -> vector<8x256xf32>
    %14 = vector.broadcast %8 : vector<8x1xf32> to vector<8x256xf32>
    %15 = arith.addf %13, %14 : vector<8x256xf32>
    %16 = vector.broadcast %3 : vector<8x1xf32> to vector<8x256xf32>
    %17 = arith.mulf %16, %15 : vector<8x256xf32>
    %18 = vector.broadcast %5 : vector<8x1xf32> to vector<8x256xf32>
    %19 = arith.mulf %18, %15 : vector<8x256xf32>
    %c17_i32 = arith.constant 17 : i32
    %20 = tpu.dynamic_rotate %15 by %c17_i32 dim 1 : vector<8x256xf32>, i32 -> vector<8x256xf32>
    %21 = vector.extract_strided_slice %0 {offsets = [0, 0], sizes = [1, 256], strides = [1, 1]} : vector<9x256xf32> to vector<1x256xf32>
    %22 = vector.broadcast %21 : vector<1x256xf32> to vector<8x256xf32>
    %23 = arith.mulf %20, %22 : vector<8x256xf32>
    %24 = vector.extract_strided_slice %1 {offsets = [0, 0], sizes = [8, 1], strides = [1, 1]} : vector<8x9xf32> to vector<8x1xf32>
    %25 = vector.broadcast %24 : vector<8x1xf32> to vector<8x256xf32>
    %26 = arith.mulf %23, %25 : vector<8x256xf32>
    %27 = arith.addf %17, %26 : vector<8x256xf32>
    %28 = vector.extract_strided_slice %2 {offsets = [0, 0], sizes = [8, 1], strides = [1, 1]} : vector<8x9xf32> to vector<8x1xf32>
    %29 = vector.broadcast %28 : vector<8x1xf32> to vector<8x256xf32>
    %30 = arith.mulf %23, %29 : vector<8x256xf32>
    %31 = arith.addf %19, %30 : vector<8x256xf32>
    %c16_i32 = arith.constant 16 : i32
    %32 = tpu.dynamic_rotate %15 by %c16_i32 dim 1 : vector<8x256xf32>, i32 -> vector<8x256xf32>
    %33 = vector.extract_strided_slice %0 {offsets = [1, 0], sizes = [1, 256], strides = [1, 1]} : vector<9x256xf32> to vector<1x256xf32>
    %34 = vector.broadcast %33 : vector<1x256xf32> to vector<8x256xf32>
    %35 = arith.mulf %32, %34 : vector<8x256xf32>
    %36 = vector.extract_strided_slice %1 {offsets = [0, 1], sizes = [8, 1], strides = [1, 1]} : vector<8x9xf32> to vector<8x1xf32>
    %37 = vector.broadcast %36 : vector<8x1xf32> to vector<8x256xf32>
    %38 = arith.mulf %35, %37 : vector<8x256xf32>
    %39 = arith.addf %27, %38 : vector<8x256xf32>
    %40 = vector.extract_strided_slice %2 {offsets = [0, 1], sizes = [8, 1], strides = [1, 1]} : vector<8x9xf32> to vector<8x1xf32>
    %41 = vector.broadcast %40 : vector<8x1xf32> to vector<8x256xf32>
    %42 = arith.mulf %35, %41 : vector<8x256xf32>
    %43 = arith.addf %31, %42 : vector<8x256xf32>
    %c15_i32 = arith.constant 15 : i32
    %44 = tpu.dynamic_rotate %15 by %c15_i32 dim 1 : vector<8x256xf32>, i32 -> vector<8x256xf32>
    %45 = vector.extract_strided_slice %0 {offsets = [2, 0], sizes = [1, 256], strides = [1, 1]} : vector<9x256xf32> to vector<1x256xf32>
    %46 = vector.broadcast %45 : vector<1x256xf32> to vector<8x256xf32>
    %47 = arith.mulf %44, %46 : vector<8x256xf32>
    %48 = vector.extract_strided_slice %1 {offsets = [0, 2], sizes = [8, 1], strides = [1, 1]} : vector<8x9xf32> to vector<8x1xf32>
    %49 = vector.broadcast %48 : vector<8x1xf32> to vector<8x256xf32>
    %50 = arith.mulf %47, %49 : vector<8x256xf32>
    %51 = arith.addf %39, %50 : vector<8x256xf32>
    %52 = vector.extract_strided_slice %2 {offsets = [0, 2], sizes = [8, 1], strides = [1, 1]} : vector<8x9xf32> to vector<8x1xf32>
    %53 = vector.broadcast %52 : vector<8x1xf32> to vector<8x256xf32>
    %54 = arith.mulf %47, %53 : vector<8x256xf32>
    %55 = arith.addf %43, %54 : vector<8x256xf32>
    %c1_i32 = arith.constant 1 : i32
    %56 = tpu.dynamic_rotate %15 by %c1_i32 dim 1 : vector<8x256xf32>, i32 -> vector<8x256xf32>
    %57 = vector.extract_strided_slice %0 {offsets = [3, 0], sizes = [1, 256], strides = [1, 1]} : vector<9x256xf32> to vector<1x256xf32>
    %58 = vector.broadcast %57 : vector<1x256xf32> to vector<8x256xf32>
    %59 = arith.mulf %56, %58 : vector<8x256xf32>
    %60 = vector.extract_strided_slice %1 {offsets = [0, 3], sizes = [8, 1], strides = [1, 1]} : vector<8x9xf32> to vector<8x1xf32>
    %61 = vector.broadcast %60 : vector<8x1xf32> to vector<8x256xf32>
    %62 = arith.mulf %59, %61 : vector<8x256xf32>
    %63 = arith.addf %51, %62 : vector<8x256xf32>
    %64 = vector.extract_strided_slice %2 {offsets = [0, 3], sizes = [8, 1], strides = [1, 1]} : vector<8x9xf32> to vector<8x1xf32>
    %65 = vector.broadcast %64 : vector<8x1xf32> to vector<8x256xf32>
    %66 = arith.mulf %59, %65 : vector<8x256xf32>
    %67 = arith.addf %55, %66 : vector<8x256xf32>
    %c255_i32 = arith.constant 255 : i32
    %68 = tpu.dynamic_rotate %15 by %c255_i32 dim 1 : vector<8x256xf32>, i32 -> vector<8x256xf32>
    %69 = vector.extract_strided_slice %0 {offsets = [5, 0], sizes = [1, 256], strides = [1, 1]} : vector<9x256xf32> to vector<1x256xf32>
    %70 = vector.broadcast %69 : vector<1x256xf32> to vector<8x256xf32>
    %71 = arith.mulf %68, %70 : vector<8x256xf32>
    %72 = vector.extract_strided_slice %1 {offsets = [0, 5], sizes = [8, 1], strides = [1, 1]} : vector<8x9xf32> to vector<8x1xf32>
    %73 = vector.broadcast %72 : vector<8x1xf32> to vector<8x256xf32>
    %74 = arith.mulf %71, %73 : vector<8x256xf32>
    %75 = arith.addf %63, %74 : vector<8x256xf32>
    %76 = vector.extract_strided_slice %2 {offsets = [0, 5], sizes = [8, 1], strides = [1, 1]} : vector<8x9xf32> to vector<8x1xf32>
    %77 = vector.broadcast %76 : vector<8x1xf32> to vector<8x256xf32>
    %78 = arith.mulf %71, %77 : vector<8x256xf32>
    %79 = arith.addf %67, %78 : vector<8x256xf32>
    %c241_i32 = arith.constant 241 : i32
    %80 = tpu.dynamic_rotate %15 by %c241_i32 dim 1 : vector<8x256xf32>, i32 -> vector<8x256xf32>
    %81 = vector.extract_strided_slice %0 {offsets = [6, 0], sizes = [1, 256], strides = [1, 1]} : vector<9x256xf32> to vector<1x256xf32>
    %82 = vector.broadcast %81 : vector<1x256xf32> to vector<8x256xf32>
    %83 = arith.mulf %80, %82 : vector<8x256xf32>
    %84 = vector.extract_strided_slice %1 {offsets = [0, 6], sizes = [8, 1], strides = [1, 1]} : vector<8x9xf32> to vector<8x1xf32>
    %85 = vector.broadcast %84 : vector<8x1xf32> to vector<8x256xf32>
    %86 = arith.mulf %83, %85 : vector<8x256xf32>
    %87 = arith.addf %75, %86 : vector<8x256xf32>
    %88 = vector.extract_strided_slice %2 {offsets = [0, 6], sizes = [8, 1], strides = [1, 1]} : vector<8x9xf32> to vector<8x1xf32>
    %89 = vector.broadcast %88 : vector<8x1xf32> to vector<8x256xf32>
    %90 = arith.mulf %83, %89 : vector<8x256xf32>
    %91 = arith.addf %79, %90 : vector<8x256xf32>
    %c240_i32 = arith.constant 240 : i32
    %92 = tpu.dynamic_rotate %15 by %c240_i32 dim 1 : vector<8x256xf32>, i32 -> vector<8x256xf32>
    %93 = vector.extract_strided_slice %0 {offsets = [7, 0], sizes = [1, 256], strides = [1, 1]} : vector<9x256xf32> to vector<1x256xf32>
    %94 = vector.broadcast %93 : vector<1x256xf32> to vector<8x256xf32>
    %95 = arith.mulf %92, %94 : vector<8x256xf32>
    %96 = vector.extract_strided_slice %1 {offsets = [0, 7], sizes = [8, 1], strides = [1, 1]} : vector<8x9xf32> to vector<8x1xf32>
    %97 = vector.broadcast %96 : vector<8x1xf32> to vector<8x256xf32>
    %98 = arith.mulf %95, %97 : vector<8x256xf32>
    %99 = arith.addf %87, %98 : vector<8x256xf32>
    %100 = vector.extract_strided_slice %2 {offsets = [0, 7], sizes = [8, 1], strides = [1, 1]} : vector<8x9xf32> to vector<8x1xf32>
    %101 = vector.broadcast %100 : vector<8x1xf32> to vector<8x256xf32>
    %102 = arith.mulf %95, %101 : vector<8x256xf32>
    %103 = arith.addf %91, %102 : vector<8x256xf32>
    %c239_i32 = arith.constant 239 : i32
    %104 = tpu.dynamic_rotate %15 by %c239_i32 dim 1 : vector<8x256xf32>, i32 -> vector<8x256xf32>
    %105 = vector.extract_strided_slice %0 {offsets = [8, 0], sizes = [1, 256], strides = [1, 1]} : vector<9x256xf32> to vector<1x256xf32>
    %106 = vector.broadcast %105 : vector<1x256xf32> to vector<8x256xf32>
    %107 = arith.mulf %104, %106 : vector<8x256xf32>
    %108 = vector.extract_strided_slice %1 {offsets = [0, 8], sizes = [8, 1], strides = [1, 1]} : vector<8x9xf32> to vector<8x1xf32>
    %109 = vector.broadcast %108 : vector<8x1xf32> to vector<8x256xf32>
    %110 = arith.mulf %107, %109 : vector<8x256xf32>
    %111 = arith.addf %99, %110 : vector<8x256xf32>
    %112 = vector.extract_strided_slice %2 {offsets = [0, 8], sizes = [8, 1], strides = [1, 1]} : vector<8x9xf32> to vector<8x1xf32>
    %113 = vector.broadcast %112 : vector<8x1xf32> to vector<8x256xf32>
    %114 = arith.mulf %107, %113 : vector<8x256xf32>
    %115 = arith.addf %103, %114 : vector<8x256xf32>
    %116 = vector.broadcast %4 : vector<8x1xf32> to vector<8x256xf32>
    %117 = arith.addf %111, %116 : vector<8x256xf32>
    %118 = vector.broadcast %6 : vector<8x1xf32> to vector<8x256xf32>
    %119 = arith.addf %115, %118 : vector<8x256xf32>
    %cst_24 = arith.constant 5.000000e-01 : f32
    %120 = vector.broadcast %cst_24 : f32 to vector<8x256xf32>
    %121 = arith.mulf %120, %119 : vector<8x256xf32>
    %cst_25 = arith.constant 0.707106769 : f32
    %122 = vector.broadcast %cst_25 : f32 to vector<8x256xf32>
    %123 = arith.mulf %119, %122 : vector<8x256xf32>
    %124 = math.absf %123 : vector<8x256xf32>
    %cst_26 = arith.constant 0.327591091 : f32
    %125 = vector.broadcast %cst_26 : f32 to vector<8x256xf32>
    %126 = arith.mulf %125, %124 : vector<8x256xf32>
    %cst_27 = arith.constant 1.000000e+00 : f32
    %127 = vector.broadcast %cst_27 : f32 to vector<8x256xf32>
    %128 = arith.addf %127, %126 : vector<8x256xf32>
    %cst_28 = arith.constant 1.000000e+00 : f32
    %129 = vector.broadcast %cst_28 : f32 to vector<8x256xf32>
    %130 = arith.divf %129, %128 : vector<8x256xf32>
    %cst_29 = arith.constant 1.06140542 : f32
    %131 = vector.broadcast %cst_29 : f32 to vector<8x256xf32>
    %132 = arith.mulf %131, %130 : vector<8x256xf32>
    %cst_30 = arith.constant -1.45315206 : f32
    %133 = vector.broadcast %cst_30 : f32 to vector<8x256xf32>
    %134 = arith.addf %132, %133 : vector<8x256xf32>
    %135 = arith.mulf %134, %130 : vector<8x256xf32>
    %cst_31 = arith.constant 1.42141378 : f32
    %136 = vector.broadcast %cst_31 : f32 to vector<8x256xf32>
    %137 = arith.addf %135, %136 : vector<8x256xf32>
    %138 = arith.mulf %137, %130 : vector<8x256xf32>
    %cst_32 = arith.constant -0.284496725 : f32
    %139 = vector.broadcast %cst_32 : f32 to vector<8x256xf32>
    %140 = arith.addf %138, %139 : vector<8x256xf32>
    %141 = arith.mulf %140, %130 : vector<8x256xf32>
    %cst_33 = arith.constant 0.254829586 : f32
    %142 = vector.broadcast %cst_33 : f32 to vector<8x256xf32>
    %143 = arith.addf %141, %142 : vector<8x256xf32>
    %144 = arith.mulf %143, %130 : vector<8x256xf32>
    %cst_34 = arith.constant 0.000000e+00 : f32
    %145 = vector.broadcast %cst_34 : f32 to vector<8x256xf32>
    %146 = arith.subf %145, %124 : vector<8x256xf32>
    %147 = arith.mulf %146, %124 : vector<8x256xf32>
    %148 = math.exp %147 : vector<8x256xf32>
    %149 = arith.mulf %144, %148 : vector<8x256xf32>
    %cst_35 = arith.constant 1.000000e+00 : f32
    %150 = vector.broadcast %cst_35 : f32 to vector<8x256xf32>
    %151 = arith.subf %150, %149 : vector<8x256xf32>
    %cst_36 = arith.constant 0.000000e+00 : f32
    %152 = vector.broadcast %cst_36 : f32 to vector<8x256xf32>
    %153 = arith.cmpf oge, %123, %152 : vector<8x256xf32>
    %cst_37 = arith.constant 0.000000e+00 : f32
    %154 = vector.broadcast %cst_37 : f32 to vector<8x256xf32>
    %155 = arith.subf %154, %151 : vector<8x256xf32>
    %156 = arith.select %153, %151, %155 : vector<8x256xi1>, vector<8x256xf32>
    %cst_38 = arith.constant 1.000000e+00 : f32
    %157 = vector.broadcast %cst_38 : f32 to vector<8x256xf32>
    %158 = arith.addf %157, %156 : vector<8x256xf32>
    %159 = arith.mulf %121, %158 : vector<8x256xf32>
    %160 = arith.mulf %159, %117 : vector<8x256xf32>
    %cst_39 = arith.constant 5.000000e-01 : f32
    %161 = vector.broadcast %cst_39 : f32 to vector<8x256xf32>
    %162 = arith.mulf %161, %117 : vector<8x256xf32>
    %cst_40 = arith.constant 0.707106769 : f32
    %163 = vector.broadcast %cst_40 : f32 to vector<8x256xf32>
    %164 = arith.mulf %117, %163 : vector<8x256xf32>
    %165 = math.absf %164 : vector<8x256xf32>
    %cst_41 = arith.constant 0.327591091 : f32
    %166 = vector.broadcast %cst_41 : f32 to vector<8x256xf32>
    %167 = arith.mulf %166, %165 : vector<8x256xf32>
    %cst_42 = arith.constant 1.000000e+00 : f32
    %168 = vector.broadcast %cst_42 : f32 to vector<8x256xf32>
    %169 = arith.addf %168, %167 : vector<8x256xf32>
    %cst_43 = arith.constant 1.000000e+00 : f32
    %170 = vector.broadcast %cst_43 : f32 to vector<8x256xf32>
    %171 = arith.divf %170, %169 : vector<8x256xf32>
    %cst_44 = arith.constant 1.06140542 : f32
    %172 = vector.broadcast %cst_44 : f32 to vector<8x256xf32>
    %173 = arith.mulf %172, %171 : vector<8x256xf32>
    %cst_45 = arith.constant -1.45315206 : f32
    %174 = vector.broadcast %cst_45 : f32 to vector<8x256xf32>
    %175 = arith.addf %173, %174 : vector<8x256xf32>
    %176 = arith.mulf %175, %171 : vector<8x256xf32>
    %cst_46 = arith.constant 1.42141378 : f32
    %177 = vector.broadcast %cst_46 : f32 to vector<8x256xf32>
    %178 = arith.addf %176, %177 : vector<8x256xf32>
    %179 = arith.mulf %178, %171 : vector<8x256xf32>
    %cst_47 = arith.constant -0.284496725 : f32
    %180 = vector.broadcast %cst_47 : f32 to vector<8x256xf32>
    %181 = arith.addf %179, %180 : vector<8x256xf32>
    %182 = arith.mulf %181, %171 : vector<8x256xf32>
    %cst_48 = arith.constant 0.254829586 : f32
    %183 = vector.broadcast %cst_48 : f32 to vector<8x256xf32>
    %184 = arith.addf %182, %183 : vector<8x256xf32>
    %185 = arith.mulf %184, %171 : vector<8x256xf32>
    %cst_49 = arith.constant 0.000000e+00 : f32
    %186 = vector.broadcast %cst_49 : f32 to vector<8x256xf32>
    %187 = arith.subf %186, %165 : vector<8x256xf32>
    %188 = arith.mulf %187, %165 : vector<8x256xf32>
    %189 = math.exp %188 : vector<8x256xf32>
    %190 = arith.mulf %185, %189 : vector<8x256xf32>
    %cst_50 = arith.constant 1.000000e+00 : f32
    %191 = vector.broadcast %cst_50 : f32 to vector<8x256xf32>
    %192 = arith.subf %191, %190 : vector<8x256xf32>
    %cst_51 = arith.constant 0.000000e+00 : f32
    %193 = vector.broadcast %cst_51 : f32 to vector<8x256xf32>
    %194 = arith.cmpf oge, %164, %193 : vector<8x256xf32>
    %cst_52 = arith.constant 0.000000e+00 : f32
    %195 = vector.broadcast %cst_52 : f32 to vector<8x256xf32>
    %196 = arith.subf %195, %192 : vector<8x256xf32>
    %197 = arith.select %194, %192, %196 : vector<8x256xi1>, vector<8x256xf32>
    %cst_53 = arith.constant 1.000000e+00 : f32
    %198 = vector.broadcast %cst_53 : f32 to vector<8x256xf32>
    %199 = arith.addf %198, %197 : vector<8x256xf32>
    %200 = arith.mulf %162, %199 : vector<8x256xf32>
    %201 = arith.mulf %200, %119 : vector<8x256xf32>
    %202 = arith.addf %160, %201 : vector<8x256xf32>
    %cst_54 = arith.constant dense<0.000000e+00> : vector<4x256xf32>
    %203 = tpu.matmul %9, %202, %cst_54 {dimension_numbers = #tpu.dot_dimension_numbers<[1], [0], [0], [1], [0, 0, 1, 1], [], []>} : vector<4x8xf32>, vector<8x256xf32>, vector<4x256xf32> -> vector<4x256xf32>
    %204 = vector.broadcast %10 : vector<4x1xf32> to vector<4x256xf32>
    %205 = arith.addf %203, %204 : vector<4x256xf32>
    %206 = arith.addf %205, %12 : vector<4x256xf32>
    %c0_55 = arith.constant 0 : index
    %c0_56 = arith.constant 0 : index
    %c0_57 = arith.constant 0 : index
    %207 = vector.load %arg13[%c0_55, %c0_56, %c0_57] : memref<2x4x256xf32, #tpu.memory_space<vmem>>, vector<1x4x256xf32>
    %208 = vector.shape_cast %207 : vector<1x4x256xf32> to vector<4x256xf32>
    %209 = vector.shape_cast %206 : vector<4x256xf32> to vector<1x4x256xf32>
    tpu.vector_store %arg13[%c0_55, %c0_56, %c0_57], %209 {strides = array<i32>} : memref<2x4x256xf32, #tpu.memory_space<vmem>>, vector<1x4x256xf32>,
    %c1 = arith.constant 1 : index
    %c0_58 = arith.constant 0 : index
    %c0_59 = arith.constant 0 : index
    %210 = vector.load %arg1[%c1, %c0_58, %c0_59] : memref<2x4x256xf32, #tpu.memory_space<vmem>>, vector<1x4x256xf32>
    %211 = vector.shape_cast %210 : vector<1x4x256xf32> to vector<4x256xf32>
    %cst_60 = arith.constant dense<0.000000e+00> : vector<8x256xf32>
    %212 = tpu.matmul %7, %211, %cst_60 {dimension_numbers = #tpu.dot_dimension_numbers<[1], [0], [0], [1], [0, 0, 1, 1], [], []>} : vector<8x4xf32>, vector<4x256xf32>, vector<8x256xf32> -> vector<8x256xf32>
    %213 = vector.broadcast %8 : vector<8x1xf32> to vector<8x256xf32>
    %214 = arith.addf %212, %213 : vector<8x256xf32>
    %215 = vector.broadcast %3 : vector<8x1xf32> to vector<8x256xf32>
    %216 = arith.mulf %215, %214 : vector<8x256xf32>
    %217 = vector.broadcast %5 : vector<8x1xf32> to vector<8x256xf32>
    %218 = arith.mulf %217, %214 : vector<8x256xf32>
    %c17_i32_61 = arith.constant 17 : i32
    %219 = tpu.dynamic_rotate %214 by %c17_i32_61 dim 1 : vector<8x256xf32>, i32 -> vector<8x256xf32>
    %220 = vector.extract_strided_slice %0 {offsets = [0, 0], sizes = [1, 256], strides = [1, 1]} : vector<9x256xf32> to vector<1x256xf32>
    %221 = vector.broadcast %220 : vector<1x256xf32> to vector<8x256xf32>
    %222 = arith.mulf %219, %221 : vector<8x256xf32>
    %223 = vector.extract_strided_slice %1 {offsets = [0, 0], sizes = [8, 1], strides = [1, 1]} : vector<8x9xf32> to vector<8x1xf32>
    %224 = vector.broadcast %223 : vector<8x1xf32> to vector<8x256xf32>
    %225 = arith.mulf %222, %224 : vector<8x256xf32>
    %226 = arith.addf %216, %225 : vector<8x256xf32>
    %227 = vector.extract_strided_slice %2 {offsets = [0, 0], sizes = [8, 1], strides = [1, 1]} : vector<8x9xf32> to vector<8x1xf32>
    %228 = vector.broadcast %227 : vector<8x1xf32> to vector<8x256xf32>
    %229 = arith.mulf %222, %228 : vector<8x256xf32>
    %230 = arith.addf %218, %229 : vector<8x256xf32>
    %c16_i32_62 = arith.constant 16 : i32
    %231 = tpu.dynamic_rotate %214 by %c16_i32_62 dim 1 : vector<8x256xf32>, i32 -> vector<8x256xf32>
    %232 = vector.extract_strided_slice %0 {offsets = [1, 0], sizes = [1, 256], strides = [1, 1]} : vector<9x256xf32> to vector<1x256xf32>
    %233 = vector.broadcast %232 : vector<1x256xf32> to vector<8x256xf32>
    %234 = arith.mulf %231, %233 : vector<8x256xf32>
    %235 = vector.extract_strided_slice %1 {offsets = [0, 1], sizes = [8, 1], strides = [1, 1]} : vector<8x9xf32> to vector<8x1xf32>
    %236 = vector.broadcast %235 : vector<8x1xf32> to vector<8x256xf32>
    %237 = arith.mulf %234, %236 : vector<8x256xf32>
    %238 = arith.addf %226, %237 : vector<8x256xf32>
    %239 = vector.extract_strided_slice %2 {offsets = [0, 1], sizes = [8, 1], strides = [1, 1]} : vector<8x9xf32> to vector<8x1xf32>
    %240 = vector.broadcast %239 : vector<8x1xf32> to vector<8x256xf32>
    %241 = arith.mulf %234, %240 : vector<8x256xf32>
    %242 = arith.addf %230, %241 : vector<8x256xf32>
    %c15_i32_63 = arith.constant 15 : i32
    %243 = tpu.dynamic_rotate %214 by %c15_i32_63 dim 1 : vector<8x256xf32>, i32 -> vector<8x256xf32>
    %244 = vector.extract_strided_slice %0 {offsets = [2, 0], sizes = [1, 256], strides = [1, 1]} : vector<9x256xf32> to vector<1x256xf32>
    %245 = vector.broadcast %244 : vector<1x256xf32> to vector<8x256xf32>
    %246 = arith.mulf %243, %245 : vector<8x256xf32>
    %247 = vector.extract_strided_slice %1 {offsets = [0, 2], sizes = [8, 1], strides = [1, 1]} : vector<8x9xf32> to vector<8x1xf32>
    %248 = vector.broadcast %247 : vector<8x1xf32> to vector<8x256xf32>
    %249 = arith.mulf %246, %248 : vector<8x256xf32>
    %250 = arith.addf %238, %249 : vector<8x256xf32>
    %251 = vector.extract_strided_slice %2 {offsets = [0, 2], sizes = [8, 1], strides = [1, 1]} : vector<8x9xf32> to vector<8x1xf32>
    %252 = vector.broadcast %251 : vector<8x1xf32> to vector<8x256xf32>
    %253 = arith.mulf %246, %252 : vector<8x256xf32>
    %254 = arith.addf %242, %253 : vector<8x256xf32>
    %c1_i32_64 = arith.constant 1 : i32
    %255 = tpu.dynamic_rotate %214 by %c1_i32_64 dim 1 : vector<8x256xf32>, i32 -> vector<8x256xf32>
    %256 = vector.extract_strided_slice %0 {offsets = [3, 0], sizes = [1, 256], strides = [1, 1]} : vector<9x256xf32> to vector<1x256xf32>
    %257 = vector.broadcast %256 : vector<1x256xf32> to vector<8x256xf32>
    %258 = arith.mulf %255, %257 : vector<8x256xf32>
    %259 = vector.extract_strided_slice %1 {offsets = [0, 3], sizes = [8, 1], strides = [1, 1]} : vector<8x9xf32> to vector<8x1xf32>
    %260 = vector.broadcast %259 : vector<8x1xf32> to vector<8x256xf32>
    %261 = arith.mulf %258, %260 : vector<8x256xf32>
    %262 = arith.addf %250, %261 : vector<8x256xf32>
    %263 = vector.extract_strided_slice %2 {offsets = [0, 3], sizes = [8, 1], strides = [1, 1]} : vector<8x9xf32> to vector<8x1xf32>
    %264 = vector.broadcast %263 : vector<8x1xf32> to vector<8x256xf32>
    %265 = arith.mulf %258, %264 : vector<8x256xf32>
    %266 = arith.addf %254, %265 : vector<8x256xf32>
    %c255_i32_65 = arith.constant 255 : i32
    %267 = tpu.dynamic_rotate %214 by %c255_i32_65 dim 1 : vector<8x256xf32>, i32 -> vector<8x256xf32>
    %268 = vector.extract_strided_slice %0 {offsets = [5, 0], sizes = [1, 256], strides = [1, 1]} : vector<9x256xf32> to vector<1x256xf32>
    %269 = vector.broadcast %268 : vector<1x256xf32> to vector<8x256xf32>
    %270 = arith.mulf %267, %269 : vector<8x256xf32>
    %271 = vector.extract_strided_slice %1 {offsets = [0, 5], sizes = [8, 1], strides = [1, 1]} : vector<8x9xf32> to vector<8x1xf32>
    %272 = vector.broadcast %271 : vector<8x1xf32> to vector<8x256xf32>
    %273 = arith.mulf %270, %272 : vector<8x256xf32>
    %274 = arith.addf %262, %273 : vector<8x256xf32>
    %275 = vector.extract_strided_slice %2 {offsets = [0, 5], sizes = [8, 1], strides = [1, 1]} : vector<8x9xf32> to vector<8x1xf32>
    %276 = vector.broadcast %275 : vector<8x1xf32> to vector<8x256xf32>
    %277 = arith.mulf %270, %276 : vector<8x256xf32>
    %278 = arith.addf %266, %277 : vector<8x256xf32>
    %c241_i32_66 = arith.constant 241 : i32
    %279 = tpu.dynamic_rotate %214 by %c241_i32_66 dim 1 : vector<8x256xf32>, i32 -> vector<8x256xf32>
    %280 = vector.extract_strided_slice %0 {offsets = [6, 0], sizes = [1, 256], strides = [1, 1]} : vector<9x256xf32> to vector<1x256xf32>
    %281 = vector.broadcast %280 : vector<1x256xf32> to vector<8x256xf32>
    %282 = arith.mulf %279, %281 : vector<8x256xf32>
    %283 = vector.extract_strided_slice %1 {offsets = [0, 6], sizes = [8, 1], strides = [1, 1]} : vector<8x9xf32> to vector<8x1xf32>
    %284 = vector.broadcast %283 : vector<8x1xf32> to vector<8x256xf32>
    %285 = arith.mulf %282, %284 : vector<8x256xf32>
    %286 = arith.addf %274, %285 : vector<8x256xf32>
    %287 = vector.extract_strided_slice %2 {offsets = [0, 6], sizes = [8, 1], strides = [1, 1]} : vector<8x9xf32> to vector<8x1xf32>
    %288 = vector.broadcast %287 : vector<8x1xf32> to vector<8x256xf32>
    %289 = arith.mulf %282, %288 : vector<8x256xf32>
    %290 = arith.addf %278, %289 : vector<8x256xf32>
    %c240_i32_67 = arith.constant 240 : i32
    %291 = tpu.dynamic_rotate %214 by %c240_i32_67 dim 1 : vector<8x256xf32>, i32 -> vector<8x256xf32>
    %292 = vector.extract_strided_slice %0 {offsets = [7, 0], sizes = [1, 256], strides = [1, 1]} : vector<9x256xf32> to vector<1x256xf32>
    %293 = vector.broadcast %292 : vector<1x256xf32> to vector<8x256xf32>
    %294 = arith.mulf %291, %293 : vector<8x256xf32>
    %295 = vector.extract_strided_slice %1 {offsets = [0, 7], sizes = [8, 1], strides = [1, 1]} : vector<8x9xf32> to vector<8x1xf32>
    %296 = vector.broadcast %295 : vector<8x1xf32> to vector<8x256xf32>
    %297 = arith.mulf %294, %296 : vector<8x256xf32>
    %298 = arith.addf %286, %297 : vector<8x256xf32>
    %299 = vector.extract_strided_slice %2 {offsets = [0, 7], sizes = [8, 1], strides = [1, 1]} : vector<8x9xf32> to vector<8x1xf32>
    %300 = vector.broadcast %299 : vector<8x1xf32> to vector<8x256xf32>
    %301 = arith.mulf %294, %300 : vector<8x256xf32>
    %302 = arith.addf %290, %301 : vector<8x256xf32>
    %c239_i32_68 = arith.constant 239 : i32
    %303 = tpu.dynamic_rotate %214 by %c239_i32_68 dim 1 : vector<8x256xf32>, i32 -> vector<8x256xf32>
    %304 = vector.extract_strided_slice %0 {offsets = [8, 0], sizes = [1, 256], strides = [1, 1]} : vector<9x256xf32> to vector<1x256xf32>
    %305 = vector.broadcast %304 : vector<1x256xf32> to vector<8x256xf32>
    %306 = arith.mulf %303, %305 : vector<8x256xf32>
    %307 = vector.extract_strided_slice %1 {offsets = [0, 8], sizes = [8, 1], strides = [1, 1]} : vector<8x9xf32> to vector<8x1xf32>
    %308 = vector.broadcast %307 : vector<8x1xf32> to vector<8x256xf32>
    %309 = arith.mulf %306, %308 : vector<8x256xf32>
    %310 = arith.addf %298, %309 : vector<8x256xf32>
    %311 = vector.extract_strided_slice %2 {offsets = [0, 8], sizes = [8, 1], strides = [1, 1]} : vector<8x9xf32> to vector<8x1xf32>
    %312 = vector.broadcast %311 : vector<8x1xf32> to vector<8x256xf32>
    %313 = arith.mulf %306, %312 : vector<8x256xf32>
    %314 = arith.addf %302, %313 : vector<8x256xf32>
    %315 = vector.broadcast %4 : vector<8x1xf32> to vector<8x256xf32>
    %316 = arith.addf %310, %315 : vector<8x256xf32>
    %317 = vector.broadcast %6 : vector<8x1xf32> to vector<8x256xf32>
    %318 = arith.addf %314, %317 : vector<8x256xf32>
    %cst_69 = arith.constant 5.000000e-01 : f32
    %319 = vector.broadcast %cst_69 : f32 to vector<8x256xf32>
    %320 = arith.mulf %319, %318 : vector<8x256xf32>
    %cst_70 = arith.constant 0.707106769 : f32
    %321 = vector.broadcast %cst_70 : f32 to vector<8x256xf32>
    %322 = arith.mulf %318, %321 : vector<8x256xf32>
    %323 = math.absf %322 : vector<8x256xf32>
    %cst_71 = arith.constant 0.327591091 : f32
    %324 = vector.broadcast %cst_71 : f32 to vector<8x256xf32>
    %325 = arith.mulf %324, %323 : vector<8x256xf32>
    %cst_72 = arith.constant 1.000000e+00 : f32
    %326 = vector.broadcast %cst_72 : f32 to vector<8x256xf32>
    %327 = arith.addf %326, %325 : vector<8x256xf32>
    %cst_73 = arith.constant 1.000000e+00 : f32
    %328 = vector.broadcast %cst_73 : f32 to vector<8x256xf32>
    %329 = arith.divf %328, %327 : vector<8x256xf32>
    %cst_74 = arith.constant 1.06140542 : f32
    %330 = vector.broadcast %cst_74 : f32 to vector<8x256xf32>
    %331 = arith.mulf %330, %329 : vector<8x256xf32>
    %cst_75 = arith.constant -1.45315206 : f32
    %332 = vector.broadcast %cst_75 : f32 to vector<8x256xf32>
    %333 = arith.addf %331, %332 : vector<8x256xf32>
    %334 = arith.mulf %333, %329 : vector<8x256xf32>
    %cst_76 = arith.constant 1.42141378 : f32
    %335 = vector.broadcast %cst_76 : f32 to vector<8x256xf32>
    %336 = arith.addf %334, %335 : vector<8x256xf32>
    %337 = arith.mulf %336, %329 : vector<8x256xf32>
    %cst_77 = arith.constant -0.284496725 : f32
    %338 = vector.broadcast %cst_77 : f32 to vector<8x256xf32>
    %339 = arith.addf %337, %338 : vector<8x256xf32>
    %340 = arith.mulf %339, %329 : vector<8x256xf32>
    %cst_78 = arith.constant 0.254829586 : f32
    %341 = vector.broadcast %cst_78 : f32 to vector<8x256xf32>
    %342 = arith.addf %340, %341 : vector<8x256xf32>
    %343 = arith.mulf %342, %329 : vector<8x256xf32>
    %cst_79 = arith.constant 0.000000e+00 : f32
    %344 = vector.broadcast %cst_79 : f32 to vector<8x256xf32>
    %345 = arith.subf %344, %323 : vector<8x256xf32>
    %346 = arith.mulf %345, %323 : vector<8x256xf32>
    %347 = math.exp %346 : vector<8x256xf32>
    %348 = arith.mulf %343, %347 : vector<8x256xf32>
    %cst_80 = arith.constant 1.000000e+00 : f32
    %349 = vector.broadcast %cst_80 : f32 to vector<8x256xf32>
    %350 = arith.subf %349, %348 : vector<8x256xf32>
    %cst_81 = arith.constant 0.000000e+00 : f32
    %351 = vector.broadcast %cst_81 : f32 to vector<8x256xf32>
    %352 = arith.cmpf oge, %322, %351 : vector<8x256xf32>
    %cst_82 = arith.constant 0.000000e+00 : f32
    %353 = vector.broadcast %cst_82 : f32 to vector<8x256xf32>
    %354 = arith.subf %353, %350 : vector<8x256xf32>
    %355 = arith.select %352, %350, %354 : vector<8x256xi1>, vector<8x256xf32>
    %cst_83 = arith.constant 1.000000e+00 : f32
    %356 = vector.broadcast %cst_83 : f32 to vector<8x256xf32>
    %357 = arith.addf %356, %355 : vector<8x256xf32>
    %358 = arith.mulf %320, %357 : vector<8x256xf32>
    %359 = arith.mulf %358, %316 : vector<8x256xf32>
    %cst_84 = arith.constant 5.000000e-01 : f32
    %360 = vector.broadcast %cst_84 : f32 to vector<8x256xf32>
    %361 = arith.mulf %360, %316 : vector<8x256xf32>
    %cst_85 = arith.constant 0.707106769 : f32
    %362 = vector.broadcast %cst_85 : f32 to vector<8x256xf32>
    %363 = arith.mulf %316, %362 : vector<8x256xf32>
    %364 = math.absf %363 : vector<8x256xf32>
    %cst_86 = arith.constant 0.327591091 : f32
    %365 = vector.broadcast %cst_86 : f32 to vector<8x256xf32>
    %366 = arith.mulf %365, %364 : vector<8x256xf32>
    %cst_87 = arith.constant 1.000000e+00 : f32
    %367 = vector.broadcast %cst_87 : f32 to vector<8x256xf32>
    %368 = arith.addf %367, %366 : vector<8x256xf32>
    %cst_88 = arith.constant 1.000000e+00 : f32
    %369 = vector.broadcast %cst_88 : f32 to vector<8x256xf32>
    %370 = arith.divf %369, %368 : vector<8x256xf32>
    %cst_89 = arith.constant 1.06140542 : f32
    %371 = vector.broadcast %cst_89 : f32 to vector<8x256xf32>
    %372 = arith.mulf %371, %370 : vector<8x256xf32>
    %cst_90 = arith.constant -1.45315206 : f32
    %373 = vector.broadcast %cst_90 : f32 to vector<8x256xf32>
    %374 = arith.addf %372, %373 : vector<8x256xf32>
    %375 = arith.mulf %374, %370 : vector<8x256xf32>
    %cst_91 = arith.constant 1.42141378 : f32
    %376 = vector.broadcast %cst_91 : f32 to vector<8x256xf32>
    %377 = arith.addf %375, %376 : vector<8x256xf32>
    %378 = arith.mulf %377, %370 : vector<8x256xf32>
    %cst_92 = arith.constant -0.284496725 : f32
    %379 = vector.broadcast %cst_92 : f32 to vector<8x256xf32>
    %380 = arith.addf %378, %379 : vector<8x256xf32>
    %381 = arith.mulf %380, %370 : vector<8x256xf32>
    %cst_93 = arith.constant 0.254829586 : f32
    %382 = vector.broadcast %cst_93 : f32 to vector<8x256xf32>
    %383 = arith.addf %381, %382 : vector<8x256xf32>
    %384 = arith.mulf %383, %370 : vector<8x256xf32>
    %cst_94 = arith.constant 0.000000e+00 : f32
    %385 = vector.broadcast %cst_94 : f32 to vector<8x256xf32>
    %386 = arith.subf %385, %364 : vector<8x256xf32>
    %387 = arith.mulf %386, %364 : vector<8x256xf32>
    %388 = math.exp %387 : vector<8x256xf32>
    %389 = arith.mulf %384, %388 : vector<8x256xf32>
    %cst_95 = arith.constant 1.000000e+00 : f32
    %390 = vector.broadcast %cst_95 : f32 to vector<8x256xf32>
    %391 = arith.subf %390, %389 : vector<8x256xf32>
    %cst_96 = arith.constant 0.000000e+00 : f32
    %392 = vector.broadcast %cst_96 : f32 to vector<8x256xf32>
    %393 = arith.cmpf oge, %363, %392 : vector<8x256xf32>
    %cst_97 = arith.constant 0.000000e+00 : f32
    %394 = vector.broadcast %cst_97 : f32 to vector<8x256xf32>
    %395 = arith.subf %394, %391 : vector<8x256xf32>
    %396 = arith.select %393, %391, %395 : vector<8x256xi1>, vector<8x256xf32>
    %cst_98 = arith.constant 1.000000e+00 : f32
    %397 = vector.broadcast %cst_98 : f32 to vector<8x256xf32>
    %398 = arith.addf %397, %396 : vector<8x256xf32>
    %399 = arith.mulf %361, %398 : vector<8x256xf32>
    %400 = arith.mulf %399, %318 : vector<8x256xf32>
    %401 = arith.addf %359, %400 : vector<8x256xf32>
    %cst_99 = arith.constant dense<0.000000e+00> : vector<4x256xf32>
    %402 = tpu.matmul %9, %401, %cst_99 {dimension_numbers = #tpu.dot_dimension_numbers<[1], [0], [0], [1], [0, 0, 1, 1], [], []>} : vector<4x8xf32>, vector<8x256xf32>, vector<4x256xf32> -> vector<4x256xf32>
    %403 = vector.broadcast %10 : vector<4x1xf32> to vector<4x256xf32>
    %404 = arith.addf %402, %403 : vector<4x256xf32>
    %405 = arith.addf %404, %211 : vector<4x256xf32>
    %c1_100 = arith.constant 1 : index
    %c0_101 = arith.constant 0 : index
    %c0_102 = arith.constant 0 : index
    %406 = vector.load %arg13[%c1_100, %c0_101, %c0_102] : memref<2x4x256xf32, #tpu.memory_space<vmem>>, vector<1x4x256xf32>
    %407 = vector.shape_cast %406 : vector<1x4x256xf32> to vector<4x256xf32>
    %408 = vector.shape_cast %405 : vector<4x256xf32> to vector<1x4x256xf32>
    tpu.vector_store %arg13[%c1_100, %c0_101, %c0_102], %408 {strides = array<i32>} : memref<2x4x256xf32, #tpu.memory_space<vmem>>, vector<1x4x256xf32>,
    return
  }
  func.func @transform_0(%arg0: i32) -> (i32, i32, i32) {
    %c0_i32 = arith.constant 0 : i32
    %c0_i32_0 = arith.constant 0 : i32
    %c0_i32_1 = arith.constant 0 : i32
    return %arg0, %c0_i32, %c0_i32_0 : i32, i32, i32
  }
  func.func @transform_1(%arg0: i32) -> (i32, i32) {
    %c0_i32 = arith.constant 0 : i32
    %c0_i32_0 = arith.constant 0 : i32
    %c0_i32_1 = arith.constant 0 : i32
    return %c0_i32, %c0_i32_0 : i32, i32
  }
  func.func @transform_2(%arg0: i32) -> (i32, i32) {
    %c0_i32 = arith.constant 0 : i32
    %c0_i32_0 = arith.constant 0 : i32
    %c0_i32_1 = arith.constant 0 : i32
    return %c0_i32, %c0_i32_0 : i32, i32
  }
  func.func @transform_3(%arg0: i32) -> (i32, i32) {
    %c0_i32 = arith.constant 0 : i32
    %c0_i32_0 = arith.constant 0 : i32
    %c0_i32_1 = arith.constant 0 : i32
    return %c0_i32, %c0_i32_0 : i32, i32
  }
  func.func @transform_4(%arg0: i32) -> (i32, i32) {
    %c0_i32 = arith.constant 0 : i32
    %c0_i32_0 = arith.constant 0 : i32
    %c0_i32_1 = arith.constant 0 : i32
    return %c0_i32, %c0_i32_0 : i32, i32
  }
  func.func @transform_5(%arg0: i32) -> (i32, i32) {
    %c0_i32 = arith.constant 0 : i32
    %c0_i32_0 = arith.constant 0 : i32
    %c0_i32_1 = arith.constant 0 : i32
    return %c0_i32, %c0_i32_0 : i32, i32
  }
  func.func @transform_6(%arg0: i32) -> (i32, i32) {
    %c0_i32 = arith.constant 0 : i32
    %c0_i32_0 = arith.constant 0 : i32
    %c0_i32_1 = arith.constant 0 : i32
    return %c0_i32, %c0_i32_0 : i32, i32
  }
  func.func @transform_7(%arg0: i32) -> (i32, i32) {
    %c0_i32 = arith.constant 0 : i32
    %c0_i32_0 = arith.constant 0 : i32
    %c0_i32_1 = arith.constant 0 : i32
    return %c0_i32, %c0_i32_0 : i32, i32
  }
  func.func @transform_8(%arg0: i32) -> (i32, i32) {
    %c0_i32 = arith.constant 0 : i32
    %c0_i32_0 = arith.constant 0 : i32
    %c0_i32_1 = arith.constant 0 : i32
    return %c0_i32, %c0_i32_0 : i32, i32
  }
  func.func @transform_9(%arg0: i32) -> (i32, i32) {
    %c0_i32 = arith.constant 0 : i32
    %c0_i32_0 = arith.constant 0 : i32
    %c0_i32_1 = arith.constant 0 : i32
    return %c0_i32, %c0_i32_0 : i32, i32
  }
  func.func @transform_10(%arg0: i32) -> (i32, i32) {
    %c0_i32 = arith.constant 0 : i32
    %c0_i32_0 = arith.constant 0 : i32
    %c0_i32_1 = arith.constant 0 : i32
    return %c0_i32, %c0_i32_0 : i32, i32
  }
  func.func @transform_11(%arg0: i32) -> (i32, i32) {
    %c0_i32 = arith.constant 0 : i32
    %c0_i32_0 = arith.constant 0 : i32
    %c0_i32_1 = arith.constant 0 : i32
    return %c0_i32, %c0_i32_0 : i32, i32
  }
  func.func @transform_12(%arg0: i32) -> (i32, i32, i32) {
    %c0_i32 = arith.constant 0 : i32
    %c0_i32_0 = arith.constant 0 : i32
    %c0_i32_1 = arith.constant 0 : i32
    return %arg0, %c0_i32, %c0_i32_0 : i32, i32, i32
  }
}

</mosaic_0001>

<bundles_post_ra>
// kernel: tpu_custom_call.1
= control target key start
LH: loop header
LB: loop body
LE: loop exit
PB: predicated region body
PF: predicated region fallthrough
CT: control target
= control target key end

     0   :  { %v1126_v2 = vmov 1   ;;  %v1127_v3 = vmov 0   ;;  %s1998_s0 = inlined_call_operand.vmem [shape: f32[2,4,256], index: 0, kind: input, shape index: {}]   ;;  %s1999_s1 = inlined_call_operand.vmem [shape: f32[9,256], index: 1, kind: input, shape index: {}]   ;;  %s2000_s2 = inlined_call_operand.vmem [shape: f32[8,4], index: 2, kind: input, shape index: {}]   ;;  %s2001_s3 = inlined_call_operand.vmem [shape: f32[8,1], index: 3, kind: input, shape index: {}]   ;;  %s2002_s4 = inlined_call_operand.vmem [shape: f32[8,9], index: 4, kind: input, shape index: {}]   ;;  %s2003_s5 = inlined_call_operand.vmem [shape: f32[8,9], index: 5, kind: input, shape index: {}]   ;;  %s2004_s6 = inlined_call_operand.vmem [shape: f32[8,1], index: 6, kind: input, shape index: {}]   ;;  %s2005_s7 = inlined_call_operand.vmem [shape: f32[8,1], index: 7, kind: input, shape index: {}]   ;;  %s2006_s8 = inlined_call_operand.vmem [shape: f32[8,1], index: 8, kind: input, shape index: {}]   ;;  %s2007_s9 = inlined_call_operand.vmem [shape: f32[8,1], index: 9, kind: input, shape index: {}]   ;;  %s2008_s10 = inlined_call_operand.vmem [shape: f32[4,8], index: 10, kind: input, shape index: {}]   ;;  %s2009_s11 = inlined_call_operand.vmem [shape: f32[4,1], index: 11, kind: input, shape index: {}]   ;;  %s2010_s12 = inlined_call_operand.hbm [shape: f32[2,4,256], index: 12, kind: output, shape index: {}]  }
   0x1   :  { %v1213_v0 = vld [vmem:[%s2003_s5] sm:$0xff]  ;;  %1050 = vset.pattern.permute.xlu0 %v1126_v2  ;;  %1047 = vset.pattern.permute.xlu2 %v1127_v3 }
   0x2   :  { %v56_v1 = vld [vmem:[%s1998_s0] sm:$0xff]  ;;  %180 = vperm.xlu0 %1050, %v1213_v0   ;;  %1048 = vset.pattern.permute.xlu1 %v1127_v3 }
   0x3   :  { %63 = vst [vmem:[#allocation1] ss:$2 sm:$0xff] %v56_v1  ;;  %v48_v4 = vld [vmem:[%s2004_s6] sm:$0xff] }
   0x4   :  { %v1226_v5 = vld [vmem:[%s2002_s4] sm:$0xff]  ;;  %117 = vperm.xlu2 %1047, %v48_v4  }
   0x5   :  { %17 = vsyncpa [#allocation3], 0  ;;  %144 = vperm.xlu1 %1048, %v1226_v5   ;;  %vm70_vm0 = vcmask 1043456   ;;  %v52_v6 = vld [vmem:[%s2000_s2] sm:$0xff]  ;;  %vm66_vm1 = vcmask 31744   ;;  %v1128_v9 = vmov 8   ;;  %v133_v51 = vlaneseq }
   0x6   :  { %v1129_v10 = vmov 2   ;;  %v1021_v11 = vld [vmem:[%s1998_s0 + $0x8] sm:$0xff]  ;;  %v53_v14 = vld [vmem:[%s2001_s3] sm:$0xff]  ;;  %v1130_v15 = vmov 3   ;;  %v1131_v19 = vmov 5   ;;  %v1132_v20 = vmov 6  }
   0x7   :  { %v50_v18 = vld [vmem:[%s2006_s8] sm:$0xff]  ;;  %v1133_v21 = vmov 7   ;;  %s1134_s8 = smov 17   ;;  %s1135_s13 = smov 16   ;;  %v1391_v53 = vand.u32 127, %v133_v51  ;;  %v1401_v55 = vld [vmem:[%s1999_s1 + $0x8] sm:$0xff] }
   0x8   :  { %s1136_s14 = smov 15   ;;  %s1137_s15 = smov 1   ;;  %v51_v39 = vld [vmem:[%s2007_s9] sm:$0xff]  ;;  %v139_v58 = vperm.slane %v1401_v55, 0 }
   0x9   :  { %s1138_s16 = smov 127   ;;  %s1139_s17 = smov 113   ;;  %v49_v45 = vld [vmem:[%s2005_s7] sm:$0xff]  ;;  %vm135_vm2 = vcmp.lt.s32.totalorder %v1391_v53, 17  ;;  %vm164_vm3 = vcmp.lt.s32.totalorder %v1391_v53, 16  ;;  %vm191_vm4 = vcmp.lt.s32.totalorder %v1391_v53, 15 }
   0xa   :  { %v64_v7 = vld.sshfl [vmem:[#allocation1] sm:$0xff pattern:$0x75316420]  ;;  %v65_v8 = vld.sshfl [vmem:[#allocation1 + $0x8] sm:$0xff pattern:$0x75316420]  ;;  %1062 = vset.pattern.permute.xlu0 %v1128_v9 }
   0xb   :  { %1015 = vmatpush.msk.msra.mxu0 %vm70_vm0, %v64_v7  ;;  %1017 = vmatpush.msk.msra.mxu1 %vm70_vm0, %v65_v8  ;;  %578 = vst [vmem:[#allocation1] ss:$2 sm:$0xff] %v56_v1  ;;  %s1140_s18 = smov 112   ;;  %s1141_s19 = smov 111   ;;  %v1396_v54 = vld [vmem:[%s1999_s1] sm:$0xff]  ;;  %vm218_vm5 = vcmp.lt.s32.totalorder %v1391_v53, 1 }
   0xc   :  { %1016 = vmatmul.msk.f32.vlgmr.msra.gmra.mxu0 %vm66_vm1, %v52_v6  ;;  %1018 = vmatmul.msk.f32.vlgmr.msra.gmra.mxu1 %vm66_vm1, %v52_v6  ;;  %v2023_v57 = vperm.slane %v1396_v54, 0  ;;  %vm245_vm6 = vcmp.lt.s32.totalorder %v1391_v53, 127  ;;  %vm272_vm7 = vcmp.lt.s32.totalorder %v1391_v53, 113  ;;  %vm299_vm8 = vcmp.lt.s32.totalorder %v1391_v53, 112  ;;  %s1003_s0 = sshll.u32 %s2010_s12, 4  ;;  %s1143_s3 = smov 128   ;;  %s1004_s0 = int_to_ptr.hbm [resolvable:$true] %s1003_s0 }
   0xd   :  { %153 = vperm.xlu2 %1047, %v1213_v0   ;;  %342 = vperm.xlu0 %1062, %v1213_v0   ;;  %vm326_vm9 = vcmp.lt.s32.totalorder %v1391_v53, 111 }
   0xe   :  { %1051 = vset.pattern.permute.xlu1 %v1129_v10 }
   0xf   :  { %199 = vperm.xlu1 %1051, %v1226_v5  }
  0x12   :  { %v1243_v12 = vld.sshfl [vmem:[#allocation1] sm:$0xff pattern:$0x75316420]  ;;  %v1245_v13 = vld.sshfl [vmem:[#allocation1 + $0x8] sm:$0xff pattern:$0x75316420] }
  0x13   :  { %2024 = vst [vmem:[#allocation5_spill] sm:$0xff] %v1243_v12 }
  0x14   :  { %594 = vst [vmem:[#allocation1] ss:$2 sm:$0xff] %v1021_v11 }
  0x15   :  { %1049 = vset.pattern.permute.xlu2 %v1126_v2  ;;  %1063 = vset.pattern.permute.xlu0 %v1127_v3 }
  0x16   :  { %172 = vperm.xlu2 %1049, %v1226_v5   ;;  %59 = vperm.xlu0 %1063, %v53_v14  }
  0x17   :  { %1053 = vset.pattern.permute.xlu1 %v1130_v15 }
  0x18   :  { %226 = vperm.xlu1 %1053, %v1226_v5  }
  0x1b   :  { %v595_v16 = vld.sshfl [vmem:[#allocation1] sm:$0xff pattern:$0x75316420]  ;;  %v596_v17 = vld.sshfl [vmem:[#allocation1 + $0x8] sm:$0xff pattern:$0x75316420] }
  0x1c   :  { %1022 = vmatpush.msk.msrb.mxu0 %vm70_vm0, %v595_v16  ;;  %1024 = vmatpush.msk.msrb.mxu1 %vm70_vm0, %v596_v17  ;;  %983 = vst [vmem:[#allocation1] ss:$2 sm:$0xff] %v1021_v11  ;;  %v2021_v16 = vperm.slane %v1401_v55, 1 }
  0x1d   :  { %1023 = vmatmul.msk.f32.vlgmr.msrb.gmra.mxu0 %vm66_vm1, %v52_v6  ;;  %1025 = vmatmul.msk.f32.vlgmr.msrb.gmra.mxu1 %vm66_vm1, %v52_v6 }
  0x1e   :  { %1052 = vset.pattern.permute.xlu2 %v1129_v10  ;;  %124 = vperm.xlu0 %1063, %v50_v18  }
  0x1f   :  { %207 = vperm.xlu2 %1052, %v1213_v0  }
  0x20   :  { %1055 = vset.pattern.permute.xlu1 %v1131_v19 }
  0x21   :  { %253 = vperm.xlu1 %1055, %v1226_v5  }
  0x27   :  { %1054 = vset.pattern.permute.xlu2 %v1130_v15 }
  0x28   :  { %234 = vperm.xlu2 %1054, %v1213_v0  }
  0x29   :  { %1057 = vset.pattern.permute.xlu1 %v1132_v20 }
  0x2a   :  { %280 = vperm.xlu1 %1057, %v1226_v5  }
  0x30   :  { %1056 = vset.pattern.permute.xlu2 %v1131_v19  ;;  %v2017_v19 = vperm.slane %v1401_v55, 2 }
  0x31   :  { %261 = vperm.xlu2 %1056, %v1213_v0  }
  0x32   :  { %1059 = vset.pattern.permute.xlu1 %v1133_v21 }
  0x33   :  { %307 = vperm.xlu1 %1059, %v1226_v5  }
  0x39   :  { %1058 = vset.pattern.permute.xlu2 %v1132_v20 }
  0x3a   :  { %288 = vperm.xlu2 %1058, %v1213_v0  }
  0x3b   :  { %1064 = vset.pattern.permute.xlu1 %v1127_v3 }
  0x42   :  { %1060 = vset.pattern.permute.xlu2 %v1133_v21 }
  0x43   :  { %315 = vperm.xlu2 %1060, %v1213_v0  }
  0x4b   :  { %1061 = vset.pattern.permute.xlu2 %v1128_v9 }
  0x4c   :  { %334 = vperm.xlu2 %1061, %v1226_v5  }
  0x54   :  { %1065 = vset.pattern.permute.xlu2 %v1127_v3 }
  0x5e   :  { %v1275_v24 = vpop.permute.xlu2 %117 }
  0x67   :  { %v1327_v35 = vpop.permute.xlu2 %153 }
  0x70   :  { %v1337_v37 = vpop.permute.xlu2 %172 }
  0x74   :  { %v1271_v22 = vpop.permute.xlu0 %180 }
  0x77   :  { %v1339_v38 = vpop.permute.xlu1 %144 }
  0x79   :  { %v1350_v40 = vpop.permute.xlu2 %207 }
  0x7f   :  { %v1273_v23 = vpop.permute.xlu0 %342 }
  0x81   :  { %v1356_v41 = vpop.permute.xlu1 %199 }
  0x82   :  { %v1360_v42 = vpop.permute.xlu2 %234 }
  0x88   :  { %v60_v25 = vpop.permute.xlu0 %59 }
  0x89   :  { %v92_v26 = vpop.f32.mrf.mxu0  ;;  %v112_v28 = vpop.f32.mrf.mxu1 }
  0x8a   :  { %v1277_v27 = vadd.f32 %v92_v26, %v60_v25  ;;  %v1279_v29 = vadd.f32 %v112_v28, %v60_v25  ;;  %v1364_v43 = vpop.permute.xlu1 %226 }
  0x8b   :  { %v1370_v44 = vpop.permute.xlu2 %261 }
  0x8c   :  { %v1283_v30 = vmul.f32 %v1275_v24, %v1277_v27  ;;  %129 = vrot.lane.b32.xlu0 %v1277_v27, %s1134_s8  ;;  %v1289_v31 = vmul.f32 %v1275_v24, %v1279_v29  ;;  %162 = vrot.lane.b32.xlu2 %v1279_v29, %s1135_s13 }
  0x8d   :  { %131 = vrot.lane.b32.xlu1 %v1279_v29, %s1134_s8 }
  0x90   :  { %v1389_v52 = vpop.permute.xlu0 %124 }
  0x91   :  { %v127_v1 = vmul.f32 %v1389_v52, %v1277_v27  ;;  %v128_v2 = vmul.f32 %v1389_v52, %v1279_v29 }
  0x93   :  { %v1375_v46 = vpop.permute.xlu1 %253 }
  0x94   :  { %187 = vrot.lane.b32.xlu0 %v1277_v27, %s1136_s14  ;;  %216 = vrot.lane.b32.xlu2 %v1279_v29, %s1137_s15  ;;  %v1379_v47 = vpop.permute.xlu2 %288 }
  0x95   :  { %160 = vrot.lane.b32.xlu1 %v1277_v27, %s1135_s13 }
  0x9a   :  { %v618_v32 = vpop.f32.mrf.mxu0  ;;  %v638_v34 = vpop.f32.mrf.mxu1 }
  0x9b   :  { %v1301_v33 = vadd.f32 %v618_v32, %v60_v25  ;;  %v1329_v36 = vadd.f32 %v638_v34, %v60_v25 }
  0x9c   :  { %241 = vrot.lane.b32.xlu0 %v1277_v27, %s1138_s16  ;;  %v1381_v48 = vpop.permute.xlu1 %280 }
  0x9d   :  { %645 = vrot.lane.b32.xlu2 %v1301_v33, %s1134_s8  ;;  %189 = vrot.lane.b32.xlu1 %v1279_v29, %s1136_s14  ;;  %v1385_v49 = vpop.permute.xlu2 %315 }
  0xa4   :  { %268 = vrot.lane.b32.xlu0 %v1277_v27, %s1139_s17 }
  0xa5   :  { %661 = vrot.lane.b32.xlu2 %v1301_v33, %s1135_s13  ;;  %214 = vrot.lane.b32.xlu1 %v1277_v27, %s1137_s15  ;;  %v1387_v50 = vpop.permute.xlu1 %307 }
  0xa6   :  { %v1403_v56 = vpop.permute.xlu2 %334 }
  0xac   :  { %295 = vrot.lane.b32.xlu0 %v1277_v27, %s1140_s18 }
  0xad   :  { %677 = vrot.lane.b32.xlu2 %v1301_v33, %s1136_s14  ;;  %243 = vrot.lane.b32.xlu1 %v1279_v29, %s1138_s16 }
  0xb4   :  { %322 = vrot.lane.b32.xlu0 %v1277_v27, %s1141_s19 }
  0xb5   :  { %693 = vrot.lane.b32.xlu2 %v1301_v33, %s1137_s15  ;;  %270 = vrot.lane.b32.xlu1 %v1279_v29, %s1139_s17 }
  0xbc   :  { %647 = vrot.lane.b32.xlu0 %v1329_v36, %s1134_s8  ;;  %s1144_s8 = smov 8  }
  0xbd   :  { %727 = vrot.lane.b32.xlu2 %v1329_v36, %s1139_s17  ;;  %297 = vrot.lane.b32.xlu1 %v1279_v29, %s1140_s18 }
  0xc4   :  { %663 = vrot.lane.b32.xlu0 %v1329_v36, %s1135_s13 }
  0xc5   :  { %743 = vrot.lane.b32.xlu2 %v1329_v36, %s1140_s18  ;;  %324 = vrot.lane.b32.xlu1 %v1279_v29, %s1141_s19 }
  0xcc   :  { %679 = vrot.lane.b32.xlu0 %v1329_v36, %s1136_s14 }
  0xcd   :  { %757 = vrot.lane.b32.xlu2 %v1301_v33, %s1141_s19  ;;  %358 = vperm.xlu1 %1064, %v51_v39  }
  0xd4   :  { %695 = vrot.lane.b32.xlu0 %v1329_v36, %s1137_s15 }
  0xd5   :  { %711 = vrot.lane.b32.xlu1 %v1329_v36, %s1138_s16 }
  0xdc   :  { %709 = vrot.lane.b32.xlu0 %v1301_v33, %s1138_s16 }
  0xdd   :  { %725 = vrot.lane.b32.xlu1 %v1301_v33, %s1139_s17 }
  0xe4   :  { %351 = vperm.xlu0 %1063, %v49_v45  }
  0xe5   :  { %741 = vrot.lane.b32.xlu1 %v1301_v33, %s1140_s18 }
  0xe6   :  { %v163_v14 = vpop.permute.xlu2 %162 }
  0xed   :  { %759 = vrot.lane.b32.xlu1 %v1329_v36, %s1141_s19 }
  0xfe   :  { %v130_v59 = vpop.permute.xlu0 %129 }
  0xff   :  { %v132_v60 = vpop.permute.xlu1 %131 }
 0x100   :  { %v136_v61 = vsel %vm135_vm2, %v130_v59, %v132_v60  ;;  %v137_v62 = vsel %vm135_vm2, %v132_v60, %v130_v59  ;;  %v217_v59 = vpop.permute.xlu2 %216 }
 0x101   :  { %v140_v63 = vmul.f32 %v2023_v57, %v137_v62  ;;  %v141_v0 = vmul.f32 %v139_v58, %v136_v61 }
 0x103   :  { %v147_v3 = vmul.f32 %v1339_v38, %v140_v63  ;;  %v148_v4 = vmul.f32 %v1339_v38, %v141_v0  ;;  %v156_v5 = vmul.f32 %v1327_v35, %v140_v63  ;;  %v157_v6 = vmul.f32 %v1327_v35, %v141_v0 }
 0x104   :  { %v2022_v63 = vperm.slane %v1396_v54, 1 }
 0x105   :  { %v1426_v7 = vadd.f32 %v147_v3, %v1283_v30  ;;  %v150_v8 = vadd.f32 %v148_v4, %v1289_v31  ;;  %v1429_v9 = vadd.f32 %v156_v5, %v127_v1  ;;  %v159_v10 = vadd.f32 %v157_v6, %v128_v2 }
 0x106   :  { %v188_v11 = vpop.permute.xlu0 %187  ;;  %v2020_v1 = vperm.slane %v1396_v54, 2  ;;  %v2014_v6 = vperm.slane %v1396_v54, 3 }
 0x107   :  { %v161_v15 = vpop.permute.xlu1 %160 }
 0x108   :  { %v165_v17 = vsel %vm164_vm3, %v161_v15, %v163_v14  ;;  %v1448_v62 = vpop.permute.xlu2 %645  ;;  %v166_v0 = vsel %vm164_vm3, %v163_v14, %v161_v15  ;;  %v2013_v15 = vperm.slane %v1396_v54, 5 }
 0x109   :  { %v170_v18 = vmul.f32 %v2021_v16, %v165_v17  ;;  %v169_v5 = vmul.f32 %v2022_v63, %v166_v0  ;;  %v2012_v17 = vperm.slane %v1401_v55, 5 }
 0x10b   :  { %v176_v21 = vmul.f32 %v1337_v37, %v170_v18  ;;  %v184_v25 = vmul.f32 %v1271_v22, %v170_v18  ;;  %v183_v18 = vmul.f32 %v1271_v22, %v169_v5 }
 0x10d   :  { %v178_v29 = vadd.f32 %v176_v21, %v150_v8  ;;  %v186_v30 = vadd.f32 %v184_v25, %v159_v10  ;;  %v2011_v8 = vperm.slane %v1401_v55, 3 }
 0x10e   :  { %v242_v20 = vpop.permute.xlu0 %241 }
 0x10f   :  { %v190_v26 = vpop.permute.xlu1 %189 }
 0x110   :  { %v192_v27 = vsel %vm191_vm4, %v188_v11, %v190_v26  ;;  %v193_v3 = vsel %vm191_vm4, %v190_v26, %v188_v11  ;;  %v2015_v26 = vperm.slane %v1396_v54, 6 }
 0x111   :  { %v197_v28 = vmul.f32 %v2017_v19, %v192_v27  ;;  %v196_v10 = vmul.f32 %v2020_v1, %v193_v3  ;;  %v1479_v27 = vpop.permute.xlu2 %661  ;;  %v1536_v19 = vld [vmem:[%s1999_s1 + $0x10] ss:$0 sm:$0xff] }
 0x113   :  { %v203_v31 = vmul.f32 %v1356_v41, %v197_v28  ;;  %v211_v32 = vmul.f32 %v1350_v40, %v197_v28 }
 0x115   :  { %v1446_v34 = vadd.f32 %v203_v31, %v178_v29  ;;  %v213_v39 = vadd.f32 %v211_v32, %v186_v30  ;;  %v2016_v30 = vperm.slane %v1401_v55, 6  ;;  %v210_v31 = vmul.f32 %v1350_v40, %v196_v10 }
 0x116   :  { %v269_v45 = vpop.permute.xlu0 %268 }
 0x117   :  { %v215_v51 = vpop.permute.xlu1 %214 }
 0x118   :  { %v219_v14 = vsel %vm218_vm5, %v215_v51, %v217_v59  ;;  %v220_v11 = vsel %vm218_vm5, %v217_v59, %v215_v51  ;;  %v2019_v59 = vperm.slane %v1396_v54, 7 }
 0x119   :  { %v223_v28 = vmul.f32 %v2014_v6, %v220_v11  ;;  %v224_v29 = vmul.f32 %v2011_v8, %v219_v14  ;;  %v2018_v11 = vperm.slane %v1401_v55, 7  ;;  %v185_v8 = vadd.f32 %v183_v18, %v1429_v9 }
 0x11b   :  { %v212_v18 = vadd.f32 %v210_v31, %v185_v8 }
 0x11e   :  { %v296_v60 = vpop.permute.xlu0 %295 }
 0x11f   :  { %v244_v61 = vpop.permute.xlu1 %243 }
 0x120   :  { %v246_v21 = vsel %vm245_vm6, %v242_v20, %v244_v61  ;;  %v247_v25 = vsel %vm245_vm6, %v244_v61, %v242_v20 }
 0x121   :  { %v250_v61 = vmul.f32 %v2013_v15, %v246_v21  ;;  %v251_v0 = vmul.f32 %v2012_v17, %v247_v25  ;;  %v237_v25 = vmul.f32 %v1360_v42, %v223_v28  ;;  %v238_v17 = vmul.f32 %v1360_v42, %v224_v29 }
 0x123   :  { %v264_v6 = vmul.f32 %v1370_v44, %v250_v61  ;;  %v239_v8 = vadd.f32 %v237_v25, %v212_v18  ;;  %v240_v31 = vadd.f32 %v238_v17, %v213_v39 }
 0x125   :  { %v266_v25 = vadd.f32 %v264_v6, %v239_v8 }
 0x126   :  { %v1454_v2 = vpop.permute.xlu0 %322 }
 0x127   :  { %v271_v4 = vpop.permute.xlu1 %270 }
 0x128   :  { %v273_v32 = vsel %vm272_vm7, %v269_v45, %v271_v4  ;;  %v274_v20 = vsel %vm272_vm7, %v271_v4, %v269_v45 }
 0x129   :  { %v277_v15 = vmul.f32 %v2015_v26, %v273_v32  ;;  %v278_v9 = vmul.f32 %v2016_v30, %v274_v20 }
 0x12b   :  { %v291_v20 = vmul.f32 %v1379_v47, %v277_v15  ;;  %v292_v30 = vmul.f32 %v1379_v47, %v278_v9 }
 0x12d   :  { %v293_v16 = vadd.f32 %v291_v20, %v266_v25  ;;  %v256_v20 = vmul.f32 %v1375_v46, %v250_v61 }
 0x12e   :  { %v648_v51 = vpop.permute.xlu0 %647 }
 0x12f   :  { %v649_v3 = vsel %vm135_vm2, %v1448_v62, %v648_v51  ;;  %v298_v14 = vpop.permute.xlu1 %297  ;;  %v650_v57 = vsel %vm135_vm2, %v648_v51, %v1448_v62  ;;  %v641_v51 = vmul.f32 %v1301_v33, %v1275_v24 }
 0x130   :  { %v1504_v45 = vmul.f32 %v649_v3, %v139_v58  ;;  %v300_v4 = vsel %vm299_vm8, %v296_v60, %v298_v14  ;;  %v301_v21 = vsel %vm299_vm8, %v298_v14, %v296_v60  ;;  %v642_v58 = vmul.f32 %v1329_v36, %v1275_v24 }
 0x131   :  { %v265_v60 = vmul.f32 %v1370_v44, %v251_v0  ;;  %v304_v14 = vmul.f32 %v2019_v59, %v300_v4  ;;  %v1526_v32 = vmul.f32 %v2018_v11, %v301_v21  ;;  %v1541_v4 = vld [vmem:[%s1999_s1 + $0x18] ss:$0 sm:$0xff]  ;;  %v175_v21 = vmul.f32 %v1337_v37, %v169_v5 }
 0x132   :  { %v654_v3 = vmul.f32 %v1504_v45, %v1339_v38  ;;  %v202_v59 = vmul.f32 %v1356_v41, %v196_v10  ;;  %v229_v10 = vmul.f32 %v1364_v43, %v223_v28  ;;  %v643_v24 = vmul.f32 %v1301_v33, %v1389_v52 }
 0x133   :  { %v267_v39 = vadd.f32 %v265_v60, %v240_v31  ;;  %v318_v17 = vmul.f32 %v1385_v49, %v304_v14  ;;  %v319_v18 = vmul.f32 %v1385_v49, %v1526_v32  ;;  %v177_v8 = vadd.f32 %v175_v21, %v1426_v7 }
 0x134   :  { %v1528_v26 = vadd.f32 %v654_v3, %v642_v58  ;;  %v678_v3 = vpop.permute.xlu2 %677  ;;  %v230_v31 = vmul.f32 %v1364_v43, %v224_v29  ;;  %v257_v7 = vmul.f32 %v1375_v46, %v251_v0  ;;  %v2025_v29 = vperm.slane %v1396_v54, 0 }
 0x135   :  { %v294_v63 = vadd.f32 %v292_v30, %v267_v39  ;;  %v320_v12 = vadd.f32 %v318_v17, %v293_v16 }
 0x136   :  { %v664_v58 = vpop.permute.xlu0 %663  ;;  %v651_v25 = vmul.f32 %v650_v57, %v2025_v29  ;;  %v232_v16 = vadd.f32 %v230_v31, %v1446_v34  ;;  %v644_v31 = vmul.f32 %v1329_v36, %v1389_v52 }
 0x137   :  { %v325_v11 = vpop.permute.xlu1 %324 }
 0x138   :  { %v327_v1 = vsel %vm326_vm9, %v1454_v2, %v325_v11  ;;  %v328_v5 = vsel %vm326_vm9, %v325_v11, %v1454_v2  ;;  %v321_v2 = vadd.f32 %v319_v18, %v294_v63  ;;  %v204_v11 = vadd.f32 %v202_v59, %v177_v8 }
 0x139   :  { %v1555_v6 = vmul.f32 %v1536_v19, %v327_v1  ;;  %v1558_v60 = vmul.f32 %v1541_v4, %v328_v5  ;;  %v283_v63 = vmul.f32 %v1381_v48, %v277_v15  ;;  %v284_v59 = vmul.f32 %v1381_v48, %v278_v9 }
 0x13a   :  { %v231_v62 = vadd.f32 %v229_v10, %v204_v11  ;;  %v259_v15 = vadd.f32 %v257_v7, %v232_v16  ;;  %v665_v9 = vsel %vm164_vm3, %v1479_v27, %v664_v58  ;;  %v653_v18 = vmul.f32 %v651_v25, %v1339_v38 }
 0x13b   :  { %v345_v30 = vmul.f32 %v1273_v23, %v1555_v6  ;;  %v346_v1 = vmul.f32 %v1273_v23, %v1558_v60  ;;  %v657_v5 = vmul.f32 %v651_v25, %v1327_v35  ;;  %v658_v8 = vmul.f32 %v1504_v45, %v1327_v35 }
 0x13c   :  { %v694_v34 = vpop.permute.xlu2 %693  ;;  %v258_v0 = vadd.f32 %v256_v20, %v231_v62  ;;  %v310_v10 = vmul.f32 %v1387_v50, %v304_v14  ;;  %v2027_v35 = vperm.slane %v1401_v55, 1  ;;  %v655_v20 = vadd.f32 %v653_v18, %v641_v51 }
 0x13d   :  { %v347_v28 = vadd.f32 %v345_v30, %v320_v12  ;;  %v348_v21 = vadd.f32 %v346_v1, %v321_v2  ;;  %v666_v12 = vsel %vm164_vm3, %v664_v58, %v1479_v27  ;;  %v2026_v2 = vperm.slane %v1396_v54, 1 }
 0x13e   :  { %v680_v39 = vpop.permute.xlu0 %679  ;;  %v285_v38 = vadd.f32 %v283_v63, %v258_v0  ;;  %v286_v58 = vadd.f32 %v284_v59, %v259_v15  ;;  %v311_v1 = vmul.f32 %v1387_v50, %v1526_v32  ;;  %v668_v45 = vmul.f32 %v665_v9, %v2027_v35 }
 0x13f   :  { %v1578_v17 = vpop.permute.xlu1 %358  ;;  %v667_v30 = vmul.f32 %v666_v12, %v2026_v2  ;;  %v681_v36 = vsel %vm191_vm4, %v678_v3, %v680_v39  ;;  %v682_v52 = vsel %vm191_vm4, %v680_v39, %v678_v3  ;;  %v659_v7 = vadd.f32 %v657_v5, %v643_v24 }
 0x140   :  { %v1585_v61 = vadd.f32 %v1578_v17, %v347_v28  ;;  %v1588_v57 = vadd.f32 %v1578_v17, %v348_v21  ;;  %v660_v28 = vadd.f32 %v658_v8, %v644_v31  ;;  %v312_v21 = vadd.f32 %v310_v10, %v285_v38 }
 0x141   :  { %v669_v32 = vmul.f32 %v667_v30, %v1337_v37  ;;  %v313_v59 = vadd.f32 %v311_v1, %v286_v58  ;;  %v670_v12 = vmul.f32 %v668_v45, %v1337_v37  ;;  %v2028_v3 = vperm.slane %v1396_v54, 2 }
 0x142   :  { %v1605_v33 = vmul.f32 0.70710677, %v1585_v61  ;;  %v1608_v27 = vmul.f32 0.70710677, %v1588_v57  ;;  %v2029_v0 = vperm.slane %v1401_v55, 2  ;;  %v673_v51 = vmul.f32 %v667_v30, %v1271_v22 }
 0x143   :  { %v683_v39 = vmul.f32 %v682_v52, %v2028_v3  ;;  %v674_v5 = vmul.f32 %v668_v45, %v1271_v22  ;;  %v337_v8 = vmul.f32 %v1403_v56, %v1555_v6  ;;  %v338_v37 = vmul.f32 %v1403_v56, %v1558_v60 }
 0x144   :  { %v367_v14 = vand.u32 2147483647, %v1605_v33  ;;  %v368_v11 = vand.u32 2147483647, %v1608_v27  ;;  %v684_v15 = vmul.f32 %v681_v36, %v2029_v0  ;;  %v728_v31 = vpop.permute.xlu2 %727  ;;  %v671_v2 = vadd.f32 %v669_v32, %v655_v20 }
 0x145   :  { %v685_v58 = vmul.f32 %v683_v39, %v1356_v41  ;;  %v689_v6 = vmul.f32 %v683_v39, %v1350_v40  ;;  %v672_v60 = vadd.f32 %v670_v12, %v1528_v26  ;;  %v2030_v45 = vperm.slane %v1396_v54, 3 }
 0x146   :  { %v696_v29 = vpop.permute.xlu0 %695  ;;  %v369_v25 = vmul.f32 0.3275911, %v367_v14  ;;  %v370_v62 = vmul.f32 0.3275911, %v368_v11  ;;  %v421_v16 = vsub.f32 0.0, %v367_v14  ;;  %v422_v18 = vsub.f32 0.0, %v368_v11 }
 0x147   :  { %v712_v63 = vpop.permute.xlu1 %711  ;;  %v698_v10 = vsel %vm218_vm5, %v696_v29, %v694_v34  ;;  %v697_v38 = vsel %vm218_vm5, %v694_v34, %v696_v29  ;;  %v686_v22 = vmul.f32 %v684_v15, %v1356_v41  ;;  %v690_v1 = vmul.f32 %v684_v15, %v1350_v40 }
 0x148   :  { %v1627_v24 = vadd.f32 1.0, %v369_v25  ;;  %v1629_v9 = vadd.f32 1.0, %v370_v62  ;;  %v423_v30 = vmul.f32 %v421_v16, %v367_v14  ;;  %v424_v35 = vmul.f32 %v422_v18, %v368_v11 }
 0x149   :  { %v699_v36 = vmul.f32 %v698_v10, %v2030_v45  ;;  %v675_v52 = vadd.f32 %v673_v51, %v659_v7  ;;  %v676_v14 = vadd.f32 %v674_v5, %v660_v28  ;;  %v2031_v34 = vperm.slane %v1401_v55, 3 }
 0x14a   :  { %1068 = vrcp.f32 %v1627_v24  ;;  %v339_v32 = vadd.f32 %v337_v8, %v312_v21  ;;  %v425_v41 = vmul.f32 1.442695, %v423_v30  ;;  %v340_v62 = vadd.f32 %v338_v37, %v313_v59 }
 0x14b   :  { %1070 = vrcp.f32 %v1629_v9  ;;  %v700_v20 = vmul.f32 %v697_v38, %v2031_v34  ;;  %v1652_v16 = vmul.f32 0.5, %v1585_v61  ;;  %v1655_v26 = vmul.f32 0.5, %v1588_v57 }
 0x14c   :  { %v687_v40 = vadd.f32 %v685_v58, %v671_v2  ;;  %v688_v11 = vadd.f32 %v686_v22, %v672_v60  ;;  %v691_v12 = vadd.f32 %v689_v6, %v675_v52  ;;  %v692_v3 = vadd.f32 %v690_v1, %v676_v14 }
 0x14d   :  { %v427_v39 = vmul.f32 1.442695, %v424_v35  ;;  %v701_v21 = vmul.f32 %v699_v36, %v1364_v43  ;;  %v702_v51 = vmul.f32 %v700_v20, %v1364_v43  ;;  %v705_v18 = vmul.f32 %v699_v36, %v1360_v42 }
 0x14e   :  { %v710_v29 = vpop.permute.xlu0 %709  ;;  %v706_v5 = vmul.f32 %v700_v20, %v1360_v42  ;;  %1072 = vpow2.f32 %v425_v41  ;;  %v2032_v8 = vperm.slane %v1396_v54, 5  ;;  %vm378_vm10 = vweird.f32 %v1627_v24  ;;  %v744_v42 = vpop.permute.xlu2 %743 }
 0x14f   :  { %v726_v25 = vpop.permute.xlu1 %725  ;;  %v713_v7 = vsel %vm245_vm6, %v710_v29, %v712_v63  ;;  %v714_v59 = vsel %vm245_vm6, %v712_v63, %v710_v29  ;;  %v2033_v2 = vperm.slane %v1401_v55, 5  ;;  %v382_v43 = vand.u32 2147483647, %v1627_v24 }
 0x150   :  { %v1659_v28 = vpop.eup %1068  ;;  %v715_v37 = vmul.f32 %v713_v7, %v2032_v8  ;;  %v729_v10 = vsel %vm272_vm7, %v726_v25, %v728_v31  ;;  %v384_v38 = vand.u32 2147483648, %v1627_v24  ;;  %1074 = vpow2.f32 %v427_v39 }
 0x151   :  { %v1664_v0 = vpop.eup %1070  ;;  %v374_v15 = vmul.f32 %v1659_v28, %v1627_v24  ;;  %v716_v30 = vmul.f32 %v714_v59, %v2033_v2  ;;  %v703_v58 = vadd.f32 %v701_v21, %v687_v40  ;;  %v730_v22 = vsel %vm272_vm7, %v728_v31, %v726_v25 }
 0x152   :  { %v389_v63 = vmul.f32 %v1664_v0, %v1629_v9  ;;  %v704_v60 = vadd.f32 %v702_v51, %v688_v11  ;;  %v707_v1 = vadd.f32 %v705_v18, %v691_v12  ;;  %v708_v35 = vadd.f32 %v706_v5, %v692_v3 }
 0x153   :  { %v375_v6 = vsub.f32 1.0, %v374_v15  ;;  %v2034_v45 = vperm.slane %v1396_v54, 6  ;;  %v717_v14 = vmul.f32 %v715_v37, %v1375_v46  ;;  %v718_v41 = vmul.f32 %v716_v30, %v1375_v46 }
 0x154   :  { %v2035_v25 = vperm.slane %v1401_v55, 6  ;;  %vm1699_vm11 = vcmp.eq.f32.partialorder %v382_v43, 8.507059e+37  ;;  %v390_v12 = vsub.f32 1.0, %v389_v63  ;;  %v1703_v7 = vpop.eup %1072  ;;  %vm379_vm12 = vweird.f32 %v1659_v28 }
 0x155   :  { %v731_v36 = vmul.f32 %v729_v10, %v2034_v45  ;;  %v376_v31 = vmul.f32 %v1659_v28, %v375_v6  ;;  %v385_v3 = vor.u32 1.1754944e-38, %v384_v38  ;;  %v721_v46 = vmul.f32 %v715_v37, %v1370_v44  ;;  %vm1727_vm13 = vmor %vm378_vm10, %vm379_vm12 }
 0x156   :  { %v1686_v52 = vpop.permute.xlu0 %351  ;;  %v732_v40 = vmul.f32 %v730_v22, %v2035_v25  ;;  %v722_v39 = vmul.f32 %v716_v30, %v1370_v44  ;;  %v1717_v15 = vpop.eup %1074  ;;  %v719_v51 = vadd.f32 %v717_v14, %v703_v58  ;;  %v720_v10 = vadd.f32 %v718_v41, %v704_v60 }
 0x157   :  { %v1690_v34 = vadd.f32 %v1686_v52, %v339_v32  ;;  %v1693_v20 = vadd.f32 %v1686_v52, %v340_v62  ;;  %v742_v29 = vpop.permute.xlu1 %741  ;;  %v377_v59 = vadd.f32 %v1659_v28, %v376_v31  ;;  %v733_v18 = vmul.f32 %v731_v36, %v1381_v48  ;;  %v758_v60 = vpop.permute.xlu2 %757 }
 0x158   :  { %v745_v21 = vsel %vm299_vm8, %v742_v29, %v744_v42  ;;  %v734_v63 = vmul.f32 %v732_v40, %v1381_v48  ;;  %v746_v44 = vsel %vm299_vm8, %v744_v42, %v742_v29  ;;  %v391_v2 = vmul.f32 %v1664_v0, %v390_v12 }
 0x159   :  { %v1706_v32 = vmul.f32 0.70710677, %v1690_v34  ;;  %v1709_v62 = vmul.f32 0.70710677, %v1693_v20  ;;  %vm393_vm14 = vweird.f32 %v1629_v9  ;;  %v2040_v38 = vperm.slane %v1396_v54, 7 }
 0x15a   :  { %v381_v48 = vsel %vm1727_vm13, %v1659_v28, %v377_v59  ;;  %v723_v42 = vadd.f32 %v721_v46, %v707_v1  ;;  %v724_v22 = vadd.f32 %v722_v39, %v708_v35  ;;  %v737_v24 = vmul.f32 %v731_v36, %v1379_v47 }
 0x15b   :  { %v449_v5 = vand.u32 2147483647, %v1706_v32  ;;  %v450_v8 = vand.u32 2147483647, %v1709_v62  ;;  %v747_v58 = vmul.f32 %v745_v21, %v2040_v38  ;;  %v738_v6 = vmul.f32 %v732_v40, %v1379_v47 }
 0x15c   :  { %v735_v45 = vadd.f32 %v733_v18, %v719_v51  ;;  %vm394_vm15 = vweird.f32 %v1664_v0  ;;  %v2041_v54 = vperm.slane %v1401_v55, 7  ;;  %v1753_v1 = vsel %vm1699_vm11, %v385_v3, %v381_v48 }
 0x15d   :  { %v451_v30 = vmul.f32 0.3275911, %v449_v5  ;;  %v452_v43 = vmul.f32 0.3275911, %v450_v8  ;;  %v392_v47 = vadd.f32 %v1664_v0, %v391_v2  ;;  %v749_v35 = vmul.f32 %v747_v58, %v1387_v50  ;;  %vm1781_vm1 = vmor %vm393_vm14, %vm394_vm15 }
 0x15e   :  { %v1747_v41 = vmul.f32 %v746_v44, %v2041_v54  ;;  %v753_v36 = vmul.f32 %v747_v58, %v1385_v49  ;;  %v503_v55 = vsub.f32 0.0, %v449_v5  ;;  %v504_v40 = vsub.f32 0.0, %v450_v8 }
 0x15f   :  { %v1740_v14 = vadd.f32 1.0, %v451_v30  ;;  %v1742_v29 = vadd.f32 1.0, %v452_v43  ;;  %v760_v31 = vpop.permute.xlu1 %759  ;;  %v403_v12 = vmul.f32 1.0614054, %v1753_v1  ;;  %v1762_v46 = vadd.f32 %v734_v63, %v720_v10 }
 0x160   :  { %v761_v28 = vsel %vm326_vm9, %v758_v60, %v760_v31  ;;  %v739_v11 = vadd.f32 %v737_v24, %v723_v42  ;;  %v1764_v3 = vadd.f32 %v738_v6, %v724_v22  ;;  %v762_v21 = vsel %vm326_vm9, %v760_v31, %v758_v60 }
 0x161   :  { %1076 = vrcp.f32 %v1740_v14  ;;  %v763_v25 = vmul.f32 %v1536_v19, %v761_v28  ;;  %v405_v51 = vadd.f32 -1.4531521, %v403_v12  ;;  %v1771_v19 = vmul.f32 0.5, %v1690_v34 }
 0x162   :  { %1078 = vrcp.f32 %v1742_v29  ;;  %v1775_v18 = vmul.f32 %v1747_v41, %v1387_v50  ;;  %v751_v10 = vadd.f32 %v749_v35, %v735_v45  ;;  %v755_v63 = vadd.f32 %v753_v36, %v739_v11 }
 0x163   :  { %v765_v39 = vmul.f32 %v763_v25, %v1403_v56  ;;  %v769_v59 = vmul.f32 %v763_v25, %v1273_v23  ;;  %v397_v53 = vand.u32 2147483647, %v1629_v9  ;;  %v505_v37 = vmul.f32 %v503_v55, %v449_v5 }
 0x164   :  { %v506_v2 = vmul.f32 %v504_v40, %v450_v8  ;;  %v407_v30 = vmul.f32 %v405_v51, %v1753_v1  ;;  %v396_v50 = vsel %vm1781_vm1, %v1664_v0, %v392_v47  ;;  %v1791_v38 = vmul.f32 %v1541_v4, %v762_v21 }
 0x165   :  { %v767_v58 = vadd.f32 %v765_v39, %v751_v10  ;;  %vm460_vm2 = vweird.f32 %v1740_v14  ;;  %v399_v48 = vand.u32 2147483648, %v1629_v9  ;;  %v771_v5 = vadd.f32 %v769_v59, %v755_v63 }
 0x166   :  { %v409_v8 = vadd.f32 1.4214138, %v407_v30  ;;  %v464_v24 = vand.u32 2147483647, %v1740_v14  ;;  %v466_v0 = vand.u32 2147483648, %v1740_v14  ;;  %vm398_vm3 = vcmp.eq.f32.partialorder %v397_v53, 8.507059e+37 }
 0x167   :  { %v1077_v43 = vpop.eup %1076  ;;  %v400_v60 = vor.u32 1.1754944e-38, %v399_v48  ;;  %v479_v31 = vand.u32 2147483647, %v1742_v29  ;;  %v481_v28 = vand.u32 2147483648, %v1742_v29  ;;  %v1805_v47 = vadd.f32 %v767_v58, %v1686_v52 }
 0x168   :  { %v1079_v42 = vpop.eup %1078  ;;  %v456_v22 = vmul.f32 %v1077_v43, %v1740_v14  ;;  %v411_v45 = vmul.f32 %v409_v8, %v1753_v1  ;;  %vm461_vm4 = vweird.f32 %v1077_v43  ;;  %v1809_v55 = vadd.f32 %v771_v5, %v1578_v17 }
 0x169   :  { %v471_v6 = vmul.f32 %v1079_v42, %v1742_v29  ;;  %v1801_v54 = vsel %vm398_vm3, %v400_v60, %v396_v50  ;;  %vm1811_vm5 = vcmp.eq.f32.partialorder %v464_v24, 8.507059e+37  ;;  %vm476_vm6 = vweird.f32 %v1079_v42  ;;  %vm462_vm7 = vmor %vm460_vm2, %vm461_vm4 }
 0x16a   :  { %v457_v4 = vsub.f32 1.0, %v456_v22  ;;  %v413_v35 = vadd.f32 -0.28449672, %v411_v45  ;;  %v404_v25 = vmul.f32 1.0614054, %v1801_v54  ;;  %v467_v59 = vor.u32 1.1754944e-38, %v466_v0 }
 0x16b   :  { %v472_v9 = vsub.f32 1.0, %v471_v6  ;;  %v1816_v11 = vmul.f32 0.70710677, %v1805_v47  ;;  %vm475_vm8 = vweird.f32 %v1742_v29  ;;  %vm480_vm9 = vcmp.eq.f32.partialorder %v479_v31, 8.507059e+37 }
 0x16c   :  { %v458_v36 = vmul.f32 %v1077_v43, %v457_v4  ;;  %v415_v39 = vmul.f32 %v413_v35, %v1753_v1  ;;  %v406_v51 = vadd.f32 -1.4531521, %v404_v25  ;;  %v1824_v63 = vmul.f32 0.70710677, %v1809_v55  ;;  %vm477_vm10 = vmor %vm475_vm8, %vm476_vm6 }
 0x16d   :  { %v473_v12 = vmul.f32 %v1079_v42, %v472_v9  ;;  %v482_v50 = vor.u32 1.1754944e-38, %v481_v28  ;;  %vm433_vm11 = vcmp.ge.f32.partialorder %v1605_v33, 0.0  ;;  %v1834_v29 = vand.u32 2147483647, %v1816_v11 }
 0x16e   :  { %v459_v21 = vadd.f32 %v1077_v43, %v458_v36  ;;  %v417_v44 = vadd.f32 0.2548296, %v415_v39  ;;  %v408_v30 = vmul.f32 %v406_v51, %v1801_v54  ;;  %v781_v48 = vand.u32 2147483647, %v1824_v63 }
 0x16f   :  { %v474_v10 = vadd.f32 %v1079_v42, %v473_v12  ;;  %v507_v24 = vmul.f32 1.442695, %v505_v37  ;;  %v754_v6 = vmul.f32 %v1747_v41, %v1385_v49  ;;  %v865_v37 = vmul.f32 0.3275911, %v1834_v29 }
 0x170   :  { %v463_v53 = vsel %vm462_vm7, %v1077_v43, %v459_v21  ;;  %v419_v22 = vmul.f32 %v417_v44, %v1753_v1  ;;  %v410_v5 = vadd.f32 1.4214138, %v408_v30  ;;  %v783_v60 = vmul.f32 0.3275911, %v781_v48 }
 0x171   :  { %v1830_v58 = vsel %vm1811_vm5, %v467_v59, %v463_v53  ;;  %v478_v14 = vsel %vm477_vm10, %v1079_v42, %v474_v10  ;;  %v509_v42 = vmul.f32 1.442695, %v506_v2  ;;  %v770_v1 = vmul.f32 %v1791_v38, %v1273_v23 }
 0x172   :  { %v485_v43 = vmul.f32 1.0614054, %v1830_v58  ;;  %v1838_v8 = vsel %vm480_vm9, %v482_v50, %v478_v14  ;;  %v429_v4 = vmul.f32 %v1703_v7, %v419_v22  ;;  %v412_v31 = vmul.f32 %v410_v5, %v1801_v54 }
 0x173   :  { %v486_v0 = vmul.f32 1.0614054, %v1838_v8  ;;  %v1847_v28 = vadd.f32 1.0, %v783_v60  ;;  %v766_v49 = vmul.f32 %v1791_v38, %v1403_v56  ;;  %v752_v7 = vadd.f32 %v1775_v18, %v1762_v46 }
 0x174   :  { %v487_v45 = vadd.f32 -1.4531521, %v485_v43  ;;  %v431_v41 = vsub.f32 1.0, %v429_v4  ;;  %v414_v2 = vadd.f32 -0.28449672, %v412_v31  ;;  %v756_v36 = vadd.f32 %v754_v6, %v1764_v3 }
 0x175   :  { %v488_v9 = vadd.f32 -1.4531521, %v486_v0  ;;  %1080 = vrcp.f32 %v1847_v28  ;;  %v1859_v39 = vadd.f32 1.0, %v865_v37  ;;  %v768_v21 = vadd.f32 %v766_v49, %v752_v7 }
 0x176   :  { %v489_v35 = vmul.f32 %v487_v45, %v1830_v58  ;;  %1082 = vpow2.f32 %v507_v24  ;;  %v435_v23 = vsub.f32 0.0, %v431_v41  ;;  %v416_v12 = vmul.f32 %v414_v2, %v1801_v54 }
 0x177   :  { %v490_v25 = vmul.f32 %v488_v9, %v1838_v8  ;;  %1084 = vpow2.f32 %v509_v42  ;;  %v772_v56 = vadd.f32 %v770_v1, %v756_v36  ;;  %vm434_vm12 = vcmp.ge.f32.partialorder %v1608_v27, 0.0 }
 0x178   :  { %v491_v40 = vadd.f32 1.4214138, %v489_v35  ;;  %v437_v46 = vsel %vm433_vm11, %v431_v41, %v435_v23  ;;  %v418_v18 = vadd.f32 0.2548296, %v416_v12  ;;  %v1866_v51 = vmul.f32 0.5, %v1693_v20 }
 0x179   :  { %v492_v38 = vadd.f32 1.4214138, %v490_v25  ;;  %v439_v59 = vadd.f32 1.0, %v437_v46  ;;  %v835_v44 = vsub.f32 0.0, %v781_v48  ;;  %v796_v50 = vand.u32 2147483647, %v1847_v28 }
 0x17a   :  { %v493_v3 = vmul.f32 %v491_v40, %v1830_v58  ;;  %v420_v30 = vmul.f32 %v418_v18, %v1801_v54  ;;  %1086 = vrcp.f32 %v1859_v39  ;;  %v798_v43 = vand.u32 2147483648, %v1847_v28 }
 0x17b   :  { %v494_v10 = vmul.f32 %v492_v38, %v1838_v8  ;;  %v1081_v33 = vpop.eup %1080  ;;  %v441_v14 = vmul.f32 %v439_v59, %v1652_v16  ;;  %v1875_v5 = vadd.f32 %v772_v56, %v1578_v17  ;;  %v1881_v60 = vadd.f32 %v768_v21, %v1686_v52 }
 0x17c   :  { %v495_v53 = vadd.f32 -0.28449672, %v493_v3  ;;  %v1083_v24 = vpop.eup %1082  ;;  %v430_v0 = vmul.f32 %v1717_v15, %v420_v30  ;;  %v788_v54 = vmul.f32 %v1081_v33, %v1847_v28  ;;  %vm792_vm13 = vweird.f32 %v1847_v28 }
 0x17d   :  { %v496_v22 = vadd.f32 -0.28449672, %v494_v10  ;;  %v1085_v42 = vpop.eup %1084  ;;  %v1884_v4 = vmul.f32 %v441_v14, %v1690_v34  ;;  %v1888_v17 = vmul.f32 %v835_v44, %v781_v48  ;;  %vm1890_vm14 = vcmp.eq.f32.partialorder %v796_v50, 8.507059e+37 }
 0x17e   :  { %v497_v6 = vmul.f32 %v495_v53, %v1830_v58  ;;  %v432_v31 = vsub.f32 1.0, %v430_v0  ;;  %v789_v1 = vsub.f32 1.0, %v788_v54  ;;  %vm515_vm15 = vcmp.ge.f32.partialorder %v1706_v32, 0.0 }
 0x17f   :  { %v498_v16 = vmul.f32 %v496_v22, %v1838_v8  ;;  %vm793_vm1 = vweird.f32 %v1081_v33  ;;  %v799_v9 = vor.u32 1.1754944e-38, %v798_v43  ;;  %v1896_v34 = vmul.f32 0.70710677, %v1875_v5 }
 0x180   :  { %v499_v45 = vadd.f32 0.2548296, %v497_v6  ;;  %v1087_v37 = vpop.eup %1086  ;;  %v436_v48 = vsub.f32 0.0, %v432_v31  ;;  %vm516_vm2 = vcmp.ge.f32.partialorder %v1709_v62, 0.0  ;;  %v790_v41 = vmul.f32 %v1081_v33, %v789_v1  ;;  %vm794_vm3 = vmor %vm792_vm13, %vm793_vm1 }
 0x181   :  { %v500_v52 = vadd.f32 0.2548296, %v498_v16  ;;  %v1901_v35 = vmul.f32 0.70710677, %v1881_v60  ;;  %v870_v7 = vmul.f32 %v1087_v37, %v1859_v39  ;;  %v878_v36 = vand.u32 2147483647, %v1859_v39 }
 0x182   :  { %v501_v49 = vmul.f32 %v499_v45, %v1830_v58  ;;  %v1907_v25 = vand.u32 2147483647, %v1896_v34  ;;  %v438_v58 = vsel %vm434_vm12, %v432_v31, %v436_v48  ;;  %v791_v40 = vadd.f32 %v1081_v33, %v790_v41 }
 0x183   :  { %v502_v2 = vmul.f32 %v500_v52, %v1838_v8  ;;  %v880_v12 = vand.u32 2147483648, %v1859_v39  ;;  %v440_v56 = vadd.f32 1.0, %v438_v58  ;;  %v871_v8 = vsub.f32 1.0, %v870_v7 }
 0x184   :  { %v511_v23 = vmul.f32 %v1083_v24, %v501_v49  ;;  %v784_v21 = vmul.f32 0.3275911, %v1907_v25  ;;  %v795_v3 = vsel %vm794_vm3, %v1081_v33, %v791_v40  ;;  %vm875_vm4 = vweird.f32 %v1087_v37 }
 0x185   :  { %v512_v38 = vmul.f32 %v1085_v42, %v502_v2  ;;  %v1917_v18 = vand.u32 2147483647, %v1901_v35  ;;  %v442_v27 = vmul.f32 %v440_v56, %v1655_v26  ;;  %v1922_v10 = vsel %vm1890_vm14, %v799_v9, %v795_v3 }
 0x186   :  { %v513_v46 = vsub.f32 1.0, %v511_v23  ;;  %v872_v44 = vmul.f32 %v1087_v37, %v871_v8  ;;  %v817_v28 = vmul.f32 1.0614054, %v1922_v10  ;;  %vm874_vm5 = vweird.f32 %v1859_v39 }
 0x187   :  { %v514_v59 = vsub.f32 1.0, %v512_v38  ;;  %v1926_v30 = vadd.f32 1.0, %v784_v21  ;;  %v444_v50 = vmul.f32 %v442_v27, %v1693_v20  ;;  %v881_v22 = vor.u32 1.1754944e-38, %v880_v12  ;;  %vm876_vm6 = vmor %vm874_vm5, %vm875_vm4 }
 0x188   :  { %v517_v53 = vsub.f32 0.0, %v513_v46  ;;  %v873_v14 = vadd.f32 %v1087_v37, %v872_v44  ;;  %v819_v43 = vadd.f32 -1.4531521, %v817_v28  ;;  %v866_v24 = vmul.f32 0.3275911, %v1917_v18 }
 0x189   :  { %v518_v33 = vsub.f32 0.0, %v514_v59  ;;  %1088 = vrcp.f32 %v1926_v30  ;;  %vm879_vm7 = vcmp.eq.f32.partialorder %v878_v36, 8.507059e+37  ;;  %v917_v32 = vsub.f32 0.0, %v1834_v29 }
 0x18a   :  { %v519_v26 = vsel %vm515_vm15, %v513_v46, %v517_v53  ;;  %v877_v0 = vsel %vm876_vm6, %v1087_v37, %v873_v14  ;;  %v821_v54 = vmul.f32 %v819_v43, %v1922_v10  ;;  %v1940_v15 = vadd.f32 1.0, %v866_v24 }
 0x18b   :  { %v521_v6 = vadd.f32 1.0, %v519_v26  ;;  %v520_v39 = vsel %vm516_vm2, %v514_v59, %v518_v33  ;;  %v882_v42 = vsel %vm879_vm7, %v881_v22, %v877_v0  ;;  %v839_v62 = vmul.f32 1.442695, %v1888_v17 }
 0x18c   :  { %v522_v20 = vadd.f32 1.0, %v520_v39  ;;  %v899_v45 = vmul.f32 1.0614054, %v882_v42  ;;  %v823_v1 = vadd.f32 1.4214138, %v821_v54  ;;  %v919_v41 = vmul.f32 %v917_v32, %v1834_v29 }
 0x18d   :  { %v523_v16 = vmul.f32 %v521_v6, %v1771_v19  ;;  %1090 = vrcp.f32 %v1940_v15  ;;  %vm534_vm8 = vcmask 64512   ;;  %v813_v23 = vand.u32 2147483648, %v1926_v30 }
 0x18e   :  { %v524_v31 = vmul.f32 %v522_v20, %v1866_v51  ;;  %v901_v9 = vadd.f32 -1.4531521, %v899_v45  ;;  %v825_v48 = vmul.f32 %v823_v1, %v1922_v10  ;;  %v1952_v51 = vld [vmem:[%s2008_s10] sm:$0xf]  ;;  %1092 = vpow2.f32 %v839_v62 }
 0x18f   :  { %v525_v52 = vmul.f32 %v523_v16, %v1585_v61  ;;  %v1089_v37 = vpop.eup %1088  ;;  %v811_v12 = vand.u32 2147483647, %v1926_v30  ;;  %vm807_vm10 = vweird.f32 %v1926_v30  ;;  %v814_v27 = vor.u32 1.1754944e-38, %v813_v23 }
 0x190   :  { %v526_v49 = vmul.f32 %v524_v31, %v1588_v57  ;;  %v903_v61 = vmul.f32 %v901_v9, %v882_v42  ;;  %v803_v17 = vmul.f32 %v1089_v37, %v1926_v30  ;;  %v827_v7 = vadd.f32 -0.28449672, %v825_v48 }
 0x191   :  { %v527_v19 = vadd.f32 %v525_v52, %v1884_v4  ;;  %v921_v4 = vmul.f32 1.442695, %v919_v41  ;;  %vm808_vm9 = vweird.f32 %v1089_v37  ;;  %v836_v59 = vsub.f32 0.0, %v1907_v25 }
 0x192   :  { %v528_v2 = vadd.f32 %v526_v49, %v444_v50  ;;  %v905_v57 = vadd.f32 1.4214138, %v903_v61  ;;  %v804_v36 = vsub.f32 1.0, %v803_v17  ;;  %v829_v29 = vmul.f32 %v827_v7, %v1922_v10  ;;  %vm809_vm11 = vmor %vm807_vm10, %vm808_vm9  ;;  %v55_v61 = vld [vmem:[%s2009_s11] sm:$0xf]  ;;  %s1142_s11 = smov [#allocation2]  }
 0x193   :  { %553 = vmatpush.msra.mxu2 %v527_v19  ;;  %v1091_v56 = vpop.eup %1090  ;;  %1094 = vpow2.f32 %v921_v4  ;;  %vm812_vm12 = vcmp.eq.f32.partialorder %v811_v12, 8.507059e+37  ;;  %v893_v22 = vand.u32 2147483647, %v1940_v15  ;;  %v895_v30 = vand.u32 2147483648, %v1940_v15  ;;  %531 = vperm.xlu2 %1065, %v55_v61   ;;  %s1001_s4 = sshll.u32 %s1142_s11, 4  ;;  %s1002_s4 = int_to_ptr.vmem [resolvable:$true] %s1001_s4 }
 0x194   :  { %573 = vmatpush.msra.mxu3 %v528_v2  ;;  %1019 = vmatmul.msk.f32.vlgmr.msra.gmra.mxu2 %vm534_vm8, %v1952_v51  ;;  %v907_v58 = vmul.f32 %v905_v57, %v882_v42  ;;  %v805_v40 = vmul.f32 %v1089_v37, %v804_v36  ;;  %v831_v38 = vadd.f32 0.2548296, %v829_v29  ;;  %v885_v46 = vmul.f32 %v1091_v56, %v1940_v15  ;;  %v1093_v44 = vpop.eup %1092 }
 0x195   :  { %1020 = vmatmul.msk.f32.vlgmr.msra.gmra.mxu3 %vm534_vm8, %v1952_v51  ;;  %vm890_vm13 = vweird.f32 %v1091_v56  ;;  %vm889_vm14 = vweird.f32 %v1940_v15  ;;  %vm847_vm15 = vcmp.ge.f32.partialorder %v1824_v63, 0.0  ;;  %v838_v32 = vmul.f32 %v836_v59, %v1907_v25 }
 0x196   :  { %v909_v8 = vadd.f32 -0.28449672, %v907_v58  ;;  %v806_v21 = vadd.f32 %v1089_v37, %v805_v40  ;;  %v833_v3 = vmul.f32 %v831_v38, %v1922_v10  ;;  %v886_v50 = vsub.f32 1.0, %v885_v46  ;;  %vm891_vm1 = vmor %vm889_vm14, %vm890_vm13 }
 0x197   :  { %v896_v16 = vor.u32 1.1754944e-38, %v895_v30  ;;  %vm894_vm2 = vcmp.eq.f32.partialorder %v893_v22, 8.507059e+37  ;;  %v777_v48 = vmul.f32 0.5, %v1809_v55  ;;  %v841_v63 = vmul.f32 1.442695, %v838_v32 }
 0x198   :  { %v911_v53 = vmul.f32 %v909_v8, %v882_v42  ;;  %v810_v28 = vsel %vm809_vm11, %v1089_v37, %v806_v21  ;;  %v843_v33 = vmul.f32 %v1093_v44, %v833_v3  ;;  %v887_v24 = vmul.f32 %v1091_v56, %v886_v50 }
 0x199   :  { %v815_v14 = vsel %vm812_vm12, %v814_v27, %v810_v28  ;;  %v1095_v20 = vpop.eup %1094  ;;  %vm929_vm3 = vcmp.ge.f32.partialorder %v1816_v11, 0.0  ;;  %v859_v29 = vmul.f32 0.5, %v1805_v47  ;;  %1096 = vpow2.f32 %v841_v63 }
 0x19a   :  { %v913_v26 = vadd.f32 0.2548296, %v911_v53  ;;  %v818_v43 = vmul.f32 1.0614054, %v815_v14  ;;  %v845_v10 = vsub.f32 1.0, %v843_v33  ;;  %v888_v0 = vadd.f32 %v1091_v56, %v887_v24 }
 0x19b   :  { %vm848_vm4 = vcmp.ge.f32.partialorder %v1896_v34, 0.0  ;;  %vm930_vm5 = vcmp.ge.f32.partialorder %v1901_v35, 0.0  ;;  %v2048_v35 = vld [vmem:[#allocation5_spill] sm:$0xff] }
 0x19c   :  { %v915_v6 = vmul.f32 %v913_v26, %v882_v42  ;;  %v820_v39 = vadd.f32 -1.4531521, %v818_v43  ;;  %v849_v54 = vsub.f32 0.0, %v845_v10  ;;  %v892_v1 = vsel %vm891_vm1, %v1091_v56, %v888_v0 }
 0x19d   :  { %v897_v62 = vsel %vm894_vm2, %v896_v16, %v892_v1  ;;  %v918_v42 = vsub.f32 0.0, %v1917_v18 }
 0x19e   :  { %v925_v45 = vmul.f32 %v1095_v20, %v915_v6  ;;  %v822_v31 = vmul.f32 %v820_v39, %v815_v14  ;;  %v851_v52 = vsel %vm847_vm15, %v845_v10, %v849_v54  ;;  %v900_v15 = vmul.f32 1.0614054, %v897_v62 }
 0x19f   :  { %v853_v9 = vadd.f32 1.0, %v851_v52  ;;  %v920_v2 = vmul.f32 %v918_v42, %v1917_v18  ;;  %v1097_v46 = vpop.eup %1096  ;;  %v860_v6 = vmul.f32 0.5, %v1881_v60 }
 0x1a0   :  { %v927_v37 = vsub.f32 1.0, %v925_v45  ;;  %v824_v49 = vadd.f32 1.4214138, %v822_v31  ;;  %v902_v25 = vadd.f32 -1.4531521, %v900_v15 }
 0x1a1   :  { %v855_v17 = vmul.f32 %v853_v9, %v777_v48  ;;  %v923_v56 = vmul.f32 1.442695, %v920_v2  ;;  %v985_v9 = vld.sshfl [vmem:[#allocation1 + $0x8] sm:$0xff pattern:$0x75316420] }
 0x1a2   :  { %v931_v41 = vsub.f32 0.0, %v927_v37  ;;  %v826_v19 = vmul.f32 %v824_v49, %v815_v14  ;;  %v904_v36 = vmul.f32 %v902_v25, %v897_v62  ;;  %v984_v15 = vld.sshfl [vmem:[#allocation1] sm:$0xff pattern:$0x75316420] }
 0x1a3   :  { %v857_v40 = vmul.f32 %v855_v17, %v1805_v47  ;;  %1098 = vpow2.f32 %v923_v56 }
 0x1a4   :  { %v933_v7 = vsel %vm929_vm3, %v927_v37, %v931_v41  ;;  %v828_v57 = vadd.f32 -0.28449672, %v826_v19  ;;  %v906_v58 = vadd.f32 1.4214138, %v904_v36 }
 0x1a5   :  { %v935_v4 = vadd.f32 1.0, %v933_v7 }
 0x1a6   :  { %v830_v23 = vmul.f32 %v828_v57, %v815_v14  ;;  %v908_v8 = vmul.f32 %v906_v58, %v897_v62 }
 0x1a7   :  { %v937_v12 = vmul.f32 %v935_v4, %v859_v29 }
 0x1a8   :  { %v832_v38 = vadd.f32 0.2548296, %v830_v23  ;;  %v910_v18 = vadd.f32 -0.28449672, %v908_v8 }
 0x1a9   :  { %v939_v11 = vmul.f32 %v937_v12, %v1809_v55  ;;  %v1099_v50 = vpop.eup %1098 }
 0x1aa   :  { %v834_v21 = vmul.f32 %v832_v38, %v815_v14  ;;  %v912_v59 = vmul.f32 %v910_v18, %v897_v62  ;;  %v778_v14 = vmul.f32 0.5, %v1875_v5 }
 0x1ab   :  { %v941_v3 = vadd.f32 %v939_v11, %v857_v40 }
 0x1ac   :  { %v844_v27 = vmul.f32 %v1097_v46, %v834_v21  ;;  %v914_v53 = vadd.f32 0.2548296, %v912_v59 }
 0x1ad   :  { %958 = vmatpush.msrb.mxu2 %v941_v3 }
 0x1ae   :  { %v846_v44 = vsub.f32 1.0, %v844_v27  ;;  %1026 = vmatmul.msk.f32.vlgmr.msrb.gmra.mxu2 %vm534_vm8, %v1952_v51  ;;  %v916_v28 = vmul.f32 %v914_v53, %v897_v62 }
 0x1b0   :  { %v850_v47 = vsub.f32 0.0, %v846_v44  ;;  %v926_v55 = vmul.f32 %v1099_v50, %v916_v28 }
 0x1b2   :  { %v852_v33 = vsel %vm848_vm4, %v846_v44, %v850_v47  ;;  %v928_v30 = vsub.f32 1.0, %v926_v55 }
 0x1b3   :  { %v854_v22 = vadd.f32 1.0, %v852_v33 }
 0x1b4   :  { %v932_v43 = vsub.f32 0.0, %v928_v30 }
 0x1b5   :  { %v856_v26 = vmul.f32 %v854_v22, %v778_v14 }
 0x1b6   :  { %v934_v10 = vsel %vm930_vm5, %v928_v30, %v932_v43 }
 0x1b7   :  { %v858_v24 = vmul.f32 %v856_v26, %v1881_v60  ;;  %v936_v39 = vadd.f32 1.0, %v934_v10 }
 0x1b9   :  { %v938_v0 = vmul.f32 %v936_v39, %v860_v6 }
 0x1bb   :  { %v940_v20 = vmul.f32 %v938_v0, %v1875_v5 }
 0x1bd   :  { %v942_v34 = vadd.f32 %v940_v20, %v858_v24 }
 0x1bf   :  { %978 = vmatpush.msrb.mxu3 %v942_v34 }
 0x1c0   :  { %1027 = vmatmul.msk.f32.vlgmr.msrb.gmra.mxu3 %vm534_vm8, %v1952_v51 }
 0x1ed   :  { %v532_v54 = vpop.permute.xlu2 %531 }
 0x217   :  { %v555_v32 = vpop.f32.mrf.mxu2 }
 0x218   :  { %v575_v16 = vpop.f32.mrf.mxu3  ;;  %v556_v45 = vadd.f32 %v555_v32, %v532_v54 }
 0x219   :  { %v576_v31 = vadd.f32 %v575_v16, %v532_v54 }
 0x21a   :  { %v583_v52 = vadd.f32 %v2048_v35, %v556_v45 }
 0x21b   :  { %v584_v1 = vadd.f32 %v1245_v13, %v576_v31 }
 0x21d   :  { %v587_v62 = vrot.slane %v584_v1, 4 }
 0x21f   :  { %v588_v60 = vsel %vm70_vm0, %v583_v52, %v587_v62 }
 0x220   :  { %590 = vst [vmem:[#allocation2] sm:$0xff] %v588_v60 }
 0x231   :  { %v960_v42 = vpop.f32.mrf.mxu2 }
 0x232   :  { %v961_v49 = vadd.f32 %v960_v42, %v532_v54 }
 0x234   :  { %v988_v48 = vadd.f32 %v984_v15, %v961_v49 }
 0x243   :  { %v980_v5 = vpop.f32.mrf.mxu3 }
 0x244   :  { %v981_v37 = vadd.f32 %v980_v5, %v532_v54 }
 0x246   :  { %v989_v51 = vadd.f32 %v985_v9, %v981_v37 }
 0x248   :  { %v992_v13 = vrot.slane %v989_v51, 4 }
 0x24a   :  { %v993_v63 = vsel %vm70_vm0, %v988_v48, %v992_v13 }
 0x24b   :  { %996 = vst [vmem:[#allocation2 + $0x8] sm:$0xff] %v993_v63 }
 0x24c   :  { %1009 = dma.vmem_to_hbm [thread:$0]  %s1002_s4, 256, %s1004_s0, [#allocation3], %s1143_s3, %s1143_s3, %s1144_s8  }
 0x24d   :  { %1124 = dma.done.wait [#allocation3], 256  }
 0x24e   :  { %1125 = vsyncadd [#allocation3], 4294967040 }
 0x24f   :  { %1014 = vsyncpa [#allocation3], 1 }

</bundles_post_ra>
